<compile_context>
chip_gen: v7x
topology: tpu7x:2x2x1
jax: 0.10.0
libtpu: 0.0.40
codegen_flags: <defaults>
</compile_context>

<pallas_src>
import numpy as np
import jax
import jax.numpy as jnp
from jax import lax
from jax.experimental import pallas as pl
from jax.experimental.pallas import tpu as pltpu

TAU = 12      # temporal-pooling window (TP default)
BETA = 0.5    # TP mixing coefficient


def _round_up(v, m):
    return (v + m - 1) // m * m


def _shift_fwd(x, d, fill):
    """y[:, t] = x[:, t - d] if t >= d else fill   (static shift d >= 1)."""
    bb, tt = x.shape
    if d >= tt:
        return jnp.full((bb, tt), fill, x.dtype)
    pad = jnp.full((bb, d), fill, x.dtype)
    return jnp.concatenate([pad, x[:, :tt - d]], axis=1)


def _shift_back(x, d):
    """y[:, t] = x[:, t + d] if t + d < T else 0   (static shift d >= 1)."""
    bb, tt = x.shape
    if d >= tt:
        return jnp.zeros((bb, tt), x.dtype)
    pad = jnp.zeros((bb, d), x.dtype)
    return jnp.concatenate([x[:, d:], pad], axis=1)


def _vsfa_kernel(len_ref,                # (Bb, 1)  int32   true sequence lengths
                 x_ref,                  # (1, Tt*Bb, IN) bf16  time-major chunk
                 w0_ref, b0_ref,         # (IN, R) bf16, (1, R) f32        -- ANN fc0
                 wih_ref, bih_ref,       # (3, R, H) bf16, (3, 1, H) f32   -- GRU W_ih (r,z,n)
                 whh_ref, bhh_ref,       # (3, H, H) bf16, (3, 1, H) f32   -- GRU W_hh (r,z,n)
                 wq_ref, bq_ref,         # (1, H) f32, (1, 1) f32          -- quality head
                 score_ref,              # (Bb, 1) f32 output
                 gr_s, gz_s, gn_s):      # (T_pad*Bb, H) f32 gate-major scratch
    rows = x_ref.shape[1]                # Tt * Bb
    Bb = score_ref.shape[0]
    H = whh_ref.shape[-1]
    T_pad = gr_s.shape[0] // Bb
    j = pl.program_id(1)
    nt = pl.num_programs(1)

    # ---- Stage 1: fused fc0 + gate-major GRU input projections for this T chunk ----
    # (n_ANNlayers == 1 -> the relu/dropout/fc loop in the PyTorch ANN never runs)
    xb = x_ref[0]                                                       # (Tt*Bb, IN) bf16
    y = jnp.dot(xb, w0_ref[...], preferred_element_type=jnp.float32) + b0_ref[...]
    y16 = y.astype(jnp.bfloat16)
    row0 = pl.multiple_of(j * rows, 8)
    for g, g_s in enumerate((gr_s, gz_s, gn_s)):
        g_s[pl.ds(row0, rows), :] = (
            jnp.dot(y16, wih_ref[g], preferred_element_type=jnp.float32) + bih_ref[g])

    # ---- Stage 2 (last chunk only): GRU recurrence + quality head + TP pooling ----
    @pl.when(j == nt - 1)
    def _():
        # hoist weight loads out of the serial loop
        whh_r, whh_z, whh_n = whh_ref[0], whh_ref[1], whh_ref[2]
        bhh_r, bhh_z, bhh_n = bhh_ref[0], bhh_ref[1], bhh_ref[2]
        wq = wq_ref[...]
        bq = bq_ref[...]
        t_lane = lax.broadcasted_iota(jnp.int32, (Bb, T_pad), 1)

        def gru_step(t, carry):
            h, q_acc = carry                                  # h: (Bb, H) f32
            s0 = pl.multiple_of(t * Bb, 8)
            xr = gr_s[pl.ds(s0, Bb), :]                       # dense aligned (Bb, H) reads
            xz = gz_s[pl.ds(s0, Bb), :]
            xn = gn_s[pl.ds(s0, Bb), :]
            h16 = h.astype(jnp.bfloat16)                      # bf16 MXU operands, f32 accum
            hr = jnp.dot(h16, whh_r, preferred_element_type=jnp.float32) + bhh_r
            hz = jnp.dot(h16, whh_z, preferred_element_type=jnp.float32) + bhh_z
            hn = jnp.dot(h16, whh_n, preferred_element_type=jnp.float32) + bhh_n
            r = jax.nn.sigmoid(xr + hr)
            z = jax.nn.sigmoid(xz + hz)
            n = jnp.tanh(xn + r * hn)                         # PyTorch GRU: b_hn stays inside r*(.)
            h_new = (1.0 - z) * n + z * h
            # quality head folded into the recurrence (lane-dense (Bb, T) accumulation)
            q_t = jnp.sum(h_new * wq, axis=-1, keepdims=True) + bq        # (Bb, 1)
            q_acc = q_acc + jnp.where(t_lane == t, q_t, 0.0)
            return h_new, q_acc

        carry0 = (jnp.zeros((Bb, H), jnp.float32),
                  jnp.zeros((Bb, T_pad), jnp.float32))
        _, q = lax.fori_loop(0, T_pad, gru_step, carry0, unroll=8)

        # ---- TP (subjectively-inspired temporal pooling), O(T * TAU) rolling windows ----
        L = len_ref[...]                                      # (Bb, 1) int32
        valid0 = t_lane < L
        w = jnp.exp(-q)
        qw = q * w

        lmin = q                                              # memory term (d = 0)
        num = jnp.where(valid0, qw, 0.0)                      # current term (softmin mean)
        den = jnp.where(valid0, w, 0.0)
        for d in range(1, TAU):
            lmin = jnp.minimum(lmin, _shift_fwd(q, d, float("inf")))
            msk = (t_lane + d) < L
            num = num + jnp.where(msk, _shift_back(qw, d), 0.0)
            den = den + jnp.where(msk, _shift_back(w, d), 0.0)

        m = num / jnp.where(den > 0.0, den, 1.0)
        tp = BETA * m + (1.0 - BETA) * lmin                   # (Bb, T_pad)

        L_f = jnp.maximum(L, 1).astype(jnp.float32)
        score_ref[...] = jnp.sum(jnp.where(valid0, tp, 0.0),
                                 axis=1, keepdims=True) / L_f


def vsfa_forward(x, input_length, params, block_b=8, block_t=None):
    """x: (B, T, IN) f32, input_length: (B,) float/int lengths.  Returns (B,) scores."""
    B, T, IN = x.shape
    R = params["w0"].shape[1]
    H = params["whh"].shape[-1]
    H3 = 3 * H

    # --- batch / time tiling ---------------------------------------------------------
    # block_b = 8 keeps >=2 "parallel" grid blocks (both v7x TensorCores busy) once
    # B >= 9; on v5e/v6e (128 MiB VMEM, 1 TC) pass block_b=16/32 to amortize the
    # per-step recurrence latency over more videos.
    Bb = max(8, _round_up(min(block_b, max(B, 8)), 8))
    B_pad = _round_up(B, Bb)
    nb = B_pad // Bb

    if block_t is None:
        Tt = min(_round_up(T, 8), 128)
        while Tt > 8 and Tt * Bb * IN * 2 > (2 << 20):    # cap x chunk at ~2 MiB / buffer
            Tt //= 2
    else:
        Tt = max(8, _round_up(block_t, 8))
    T_pad = _round_up(T, Tt)
    nt = T_pad // Tt

    # --- layout plumbing (wrapper-side, pure XLA) --------------------------------------
    # bf16 halves the dominant x HBM stream; group videos into batch blocks, then lay
    # each block out time-major so every grid block is one contiguous (Tt*Bb, IN) slab.
    x_p = x.astype(jnp.bfloat16)
    x_p = jnp.pad(x_p, ((0, B_pad - B), (0, T_pad - T), (0, 0)))
    x_p = x_p.reshape(nb, Bb, T_pad, IN).transpose(0, 2, 1, 3).reshape(nb, T_pad * Bb, IN)

    lengths = jnp.minimum(input_length.astype(jnp.int32), T).reshape(B, 1)
    if B_pad != B:
        lengths = jnp.pad(lengths, ((0, B_pad - B), (0, 0)))

    w0_bf = params["w0"].astype(jnp.bfloat16)
    wih_bf = params["wih"].astype(jnp.bfloat16)
    whh_bf = params["whh"].astype(jnp.bfloat16)

    # --- VMEM budget / cost hint -------------------------------------------------------
    lane = lambda v: _round_up(v, 128)
    vmem_need = (2 * Tt * Bb * IN * 2                                    # x chunk, 2-buffered
                 + 2 * (IN * lane(R) + 3 * R * lane(H) + 3 * H * lane(H)) * 2
                 + 3 * T_pad * Bb * lane(H) * 4                          # gate scratch (f32)
                 + (4 << 20))                                            # intermediates/slack
    try:
        cap = int(getattr(pltpu.get_tpu_info(), "vmem_capacity_bytes", 128 << 20))
    except Exception:
        cap = 64 << 20
    vmem_limit = max(16 << 20, min(int(vmem_need), int(cap * 0.9)))

    flops = 2 * B_pad * T_pad * (IN * R + R * H3 + H * H3) + 60 * B_pad * T_pad
    transcendentals = B_pad * T_pad * (3 * H + 1)
    bytes_accessed = (B_pad * T_pad * IN * 2
                      + (IN * R + R * H3 + H * H3) * 2 + B_pad * 8)

    grid_spec = pltpu.PrefetchScalarGridSpec(
        num_scalar_prefetch=0,
        grid=(nb, nt),
        in_specs=[
            pl.BlockSpec((Bb, 1), lambda i, j: (i, 0)),                  # lengths
            pl.BlockSpec((1, Tt * Bb, IN), lambda i, j: (i, j, 0)),      # x chunk (bf16)
            pl.BlockSpec((IN, R), lambda i, j: (0, 0)),                  # fc0 weight (bf16)
            pl.BlockSpec((1, R), lambda i, j: (0, 0)),                   # fc0 bias
            pl.BlockSpec((3, R, H), lambda i, j: (0, 0, 0)),             # W_ih gate-major (bf16)
            pl.BlockSpec((3, 1, H), lambda i, j: (0, 0, 0)),             # b_ih gate-major
            pl.BlockSpec((3, H, H), lambda i, j: (0, 0, 0)),             # W_hh gate-major (bf16)
            pl.BlockSpec((3, 1, H), lambda i, j: (0, 0, 0)),             # b_hh gate-major
            pl.BlockSpec((1, H), lambda i, j: (0, 0)),                   # quality weight row
            pl.BlockSpec((1, 1), lambda i, j: (0, 0)),                   # quality bias
        ],
        out_specs=pl.BlockSpec((Bb, 1), lambda i, j: (i, 0)),            # resident across j
        scratch_shapes=[pltpu.VMEM((T_pad * Bb, H), jnp.float32) for _ in range(3)],
    )

    score = pl.pallas_call(
        _vsfa_kernel,
        out_shape=jax.ShapeDtypeStruct((B_pad, 1), jnp.float32),
        grid_spec=grid_spec,
        compiler_params=pltpu.CompilerParams(
            dimension_semantics=("parallel", "arbitrary"),   # videos parallel, time sequential
            vmem_limit_bytes=int(vmem_limit),
        ),
        cost_estimate=pl.CostEstimate(
            flops=int(flops),
            transcendentals=int(transcendentals),
            bytes_accessed=int(bytes_accessed),
        ),
    )(lengths, x_p, w0_bf, params["b0"], wih_bf, params["bih"],
      whh_bf, params["bhh"], params["wq"], params["bq"])
    return score[:B, 0]


def init_params(key, input_size, reduced_size, hidden_size):
    """Deterministic init mimicking PyTorch uniform(-1/sqrt(fan), 1/sqrt(fan)).

    Weights are returned pre-transposed / gate-major for the kernel:
      w0 (IN, R); wih, whh (3, ., H) with gate order (r, z, n); biases as (3, 1, H);
      wq (1, H); bq (1, 1).
    """
    ks = jax.random.split(key, 8)

    def u(k, shape, fan):
        b = 1.0 / np.sqrt(fan)
        return jax.random.uniform(k, shape, jnp.float32, -b, b)

    w0 = u(ks[0], (reduced_size, input_size), input_size)            # torch (out, in)
    b0 = u(ks[1], (reduced_size,), input_size)
    wih = u(ks[2], (3, hidden_size, reduced_size), hidden_size)      # (g, out, in), g = r,z,n
    whh = u(ks[3], (3, hidden_size, hidden_size), hidden_size)
    bih = u(ks[4], (3, hidden_size), hidden_size)
    bhh = u(ks[5], (3, hidden_size), hidden_size)
    wq = u(ks[6], (1, hidden_size), hidden_size)
    bq = u(ks[7], (1,), hidden_size)
    return {
        "w0": jnp.transpose(w0),                          # (IN, R)
        "b0": b0.reshape(1, reduced_size),
        "wih": jnp.transpose(wih, (0, 2, 1)),             # (3, R, H)
        "whh": jnp.transpose(whh, (0, 2, 1)),             # (3, H, H)
        "bih": bih.reshape(3, 1, hidden_size),
        "bhh": bhh.reshape(3, 1, hidden_size),
        "wq": wq,                                          # (1, H)
        "bq": bq.reshape(1, 1),
    }


def vsfa_reference(x, input_length, params):
    """Pure numpy (f32/f64) reference of the PyTorch forward pass."""
    x = np.asarray(x, np.float32)
    w0, b0 = np.asarray(params["w0"]), np.asarray(params["b0"])
    wih, bih = np.asarray(params["wih"]), np.asarray(params["bih"])
    whh, bhh = np.asarray(params["whh"]), np.asarray(params["bhh"])
    wq = np.asarray(params["wq"]).reshape(-1)
    bq = float(np.asarray(params["bq"]).reshape(()))
    B, T, _ = x.shape
    H = whh.shape[-1]

    def sigmoid(v):
        return 1.0 / (1.0 + np.exp(-v))

    y = x @ w0 + b0                                       # (B, T, R)
    gr = y @ wih[0] + bih[0]
    gz = y @ wih[1] + bih[1]
    gn = y @ wih[2] + bih[2]
    h = np.zeros((B, H), np.float32)
    q = np.zeros((B, T), np.float32)
    for t in range(T):
        r = sigmoid(gr[:, t] + h @ whh[0] + bhh[0])
        z = sigmoid(gz[:, t] + h @ whh[1] + bhh[1])
        n = np.tanh(gn[:, t] + r * (h @ whh[2] + bhh[2]))
        h = (1.0 - z) * n + z * h
        q[:, t] = h @ wq + bq

    scores = np.zeros((B,), np.float32)
    for i in range(B):
        L = int(input_length[i])
        qi = q[i, :L].astype(np.float64)
        lvals = np.array([qi[max(0, t - TAU + 1): t + 1].min() for t in range(L)])
        mvals = np.zeros(L)
        for t in range(L):
            seg = qi[t: min(L, t + TAU)]
            w = np.exp(-seg)
            mvals[t] = (seg * w).sum() / w.sum()
        scores[i] = np.mean(BETA * mvals + (1.0 - BETA) * lvals)
    return scores


if __name__ == "__main__":
    B, T = 2, 8
    INPUT_SIZE, REDUCED_SIZE, HIDDEN_SIZE = 64, 32, 32

    key = jax.random.PRNGKey(0)
    kx, kp = jax.random.split(key)
    x = jax.random.normal(kx, (B, T, INPUT_SIZE), jnp.float32)
    input_length = jnp.array([8.0, 5.0], jnp.float32)     # float lengths, as used in PyTorch
    params = init_params(kp, INPUT_SIZE, REDUCED_SIZE, HIDDEN_SIZE)

    score = jax.block_until_ready(vsfa_forward(x, input_length, params))

    ref = vsfa_reference(np.asarray(x), np.asarray(input_length), params)
    # fc0 / W_ih / W_hh matmuls use bf16 MXU operands (f32 accumulation), so compare
    # against the pure-f32 reference at a bf16-scale tolerance.
    np.testing.assert_allclose(np.asarray(score), ref, rtol=2e-2, atol=2e-2)
    print("KERNEL_OK")
</pallas_src>

<mosaic_0001>
module attributes {stable_mosaic.version = 11 : i64} {
  func.func @_vsfa_kernel(%arg0: i32, %arg1: i32, %arg2: memref<8x1xi32, #tpu.memory_space<vmem>>, %arg3: memref<1x64x64xbf16, #tpu.memory_space<vmem>>, %arg4: memref<64x32xbf16, #tpu.memory_space<vmem>>, %arg5: memref<1x32xf32, #tpu.memory_space<vmem>>, %arg6: memref<3x32x32xbf16, #tpu.memory_space<vmem>>, %arg7: memref<3x1x32xf32, #tpu.memory_space<vmem>>, %arg8: memref<3x32x32xbf16, #tpu.memory_space<vmem>>, %arg9: memref<3x1x32xf32, #tpu.memory_space<vmem>>, %arg10: memref<1x32xf32, #tpu.memory_space<vmem>>, %arg11: memref<1x1xf32, #tpu.memory_space<vmem>>, %arg12: memref<8x1xf32, #tpu.memory_space<vmem>>, %arg13: memref<64x32xf32, #tpu.memory_space<vmem>>, %arg14: memref<64x32xf32, #tpu.memory_space<vmem>>, %arg15: memref<64x32xf32, #tpu.memory_space<vmem>>) attributes {dimension_semantics = [#tpu.dimension_semantics<parallel>, #tpu.dimension_semantics<arbitrary>], iteration_bounds = array<i64: 1, 1>, scalar_prefetch = 0 : i64, scratch_operands = 3 : i64, tpu.core_type = #tpu.core_type<tc>, window_params = [{transform_indices = @transform_0, window_bounds = array<i64: 8, 1>}, {transform_indices = @transform_1, window_bounds = array<i64: 1, 64, 64>}, {pipeline_mode = #tpu.pipeline_mode<synchronous>, transform_indices = @transform_2, window_bounds = array<i64: 64, 32>}, {pipeline_mode = #tpu.pipeline_mode<synchronous>, transform_indices = @transform_3, window_bounds = array<i64: 1, 32>}, {pipeline_mode = #tpu.pipeline_mode<synchronous>, transform_indices = @transform_4, window_bounds = array<i64: 3, 32, 32>}, {pipeline_mode = #tpu.pipeline_mode<synchronous>, transform_indices = @transform_5, window_bounds = array<i64: 3, 1, 32>}, {pipeline_mode = #tpu.pipeline_mode<synchronous>, transform_indices = @transform_6, window_bounds = array<i64: 3, 32, 32>}, {pipeline_mode = #tpu.pipeline_mode<synchronous>, transform_indices = @transform_7, window_bounds = array<i64: 3, 1, 32>}, {pipeline_mode = #tpu.pipeline_mode<synchronous>, transform_indices = @transform_8, window_bounds = array<i64: 1, 32>}, {pipeline_mode = #tpu.pipeline_mode<synchronous>, transform_indices = @transform_9, window_bounds = array<i64: 1, 1>}, {transform_indices = @transform_10, window_bounds = array<i64: 8, 1>}]} {
    %c0 = arith.constant 0 : index
    %c0_0 = arith.constant 0 : index
    %c0_1 = arith.constant 0 : index
    %0 = vector.load %arg3[%c0, %c0_0, %c0_1] : memref<1x64x64xbf16, #tpu.memory_space<vmem>>, vector<1x64x64xbf16>
    %1 = vector.shape_cast %0 : vector<1x64x64xbf16> to vector<64x64xbf16>
    %c0_2 = arith.constant 0 : index
    %c0_3 = arith.constant 0 : index
    %2 = vector.load %arg4[%c0_2, %c0_3] : memref<64x32xbf16, #tpu.memory_space<vmem>>, vector<64x32xbf16>
    %cst = arith.constant dense<0.000000e+00> : vector<64x32xf32>
    %3 = tpu.matmul %1, %2, %cst {dimension_numbers = #tpu.dot_dimension_numbers<[1], [0], [0], [1], [0, 0, 1, 1], [], []>} : vector<64x64xbf16>, vector<64x32xbf16>, vector<64x32xf32> -> vector<64x32xf32>
    %c0_4 = arith.constant 0 : index
    %c0_5 = arith.constant 0 : index
    %4 = vector.load %arg5[%c0_4, %c0_5] : memref<1x32xf32, #tpu.memory_space<vmem>>, vector<1x32xf32>
    %5 = vector.broadcast %4 : vector<1x32xf32> to vector<64x32xf32>
    %6 = arith.addf %3, %5 : vector<64x32xf32>
    %7 = arith.truncf %6 : vector<64x32xf32> to vector<64x32xbf16>
    %c64_i32 = arith.constant 64 : i32
    %8 = arith.muli %arg1, %c64_i32 : i32
    %9 = tpu.assume_multiple %8, 8 : i32
    %c0_6 = arith.constant 0 : index
    %c0_7 = arith.constant 0 : index
    %c0_8 = arith.constant 0 : index
    %10 = vector.load %arg6[%c0_6, %c0_7, %c0_8] : memref<3x32x32xbf16, #tpu.memory_space<vmem>>, vector<1x32x32xbf16>
    %11 = vector.shape_cast %10 : vector<1x32x32xbf16> to vector<32x32xbf16>
    %cst_9 = arith.constant dense<0.000000e+00> : vector<64x32xf32>
    %12 = tpu.matmul %7, %11, %cst_9 {dimension_numbers = #tpu.dot_dimension_numbers<[1], [0], [0], [1], [0, 0, 1, 1], [], []>} : vector<64x32xbf16>, vector<32x32xbf16>, vector<64x32xf32> -> vector<64x32xf32>
    %c0_10 = arith.constant 0 : index
    %c0_11 = arith.constant 0 : index
    %c0_12 = arith.constant 0 : index
    %13 = vector.load %arg7[%c0_10, %c0_11, %c0_12] : memref<3x1x32xf32, #tpu.memory_space<vmem>>, vector<1x1x32xf32>
    %14 = vector.shape_cast %13 : vector<1x1x32xf32> to vector<1x32xf32>
    %15 = vector.broadcast %14 : vector<1x32xf32> to vector<64x32xf32>
    %16 = arith.addf %12, %15 : vector<64x32xf32>
    %17 = arith.index_cast %9 : i32 to index
    %c0_13 = arith.constant 0 : index
    %18 = vector.load %arg13[%17, %c0_13] : memref<64x32xf32, #tpu.memory_space<vmem>>, vector<64x32xf32>
    tpu.vector_store %arg13[%17, %c0_13], %16 {strides = array<i32>} : memref<64x32xf32, #tpu.memory_space<vmem>>, vector<64x32xf32>,
    %c1 = arith.constant 1 : index
    %c0_14 = arith.constant 0 : index
    %c0_15 = arith.constant 0 : index
    %19 = vector.load %arg6[%c1, %c0_14, %c0_15] : memref<3x32x32xbf16, #tpu.memory_space<vmem>>, vector<1x32x32xbf16>
    %20 = vector.shape_cast %19 : vector<1x32x32xbf16> to vector<32x32xbf16>
    %cst_16 = arith.constant dense<0.000000e+00> : vector<64x32xf32>
    %21 = tpu.matmul %7, %20, %cst_16 {dimension_numbers = #tpu.dot_dimension_numbers<[1], [0], [0], [1], [0, 0, 1, 1], [], []>} : vector<64x32xbf16>, vector<32x32xbf16>, vector<64x32xf32> -> vector<64x32xf32>
    %c1_17 = arith.constant 1 : index
    %c0_18 = arith.constant 0 : index
    %c0_19 = arith.constant 0 : index
    %22 = vector.load %arg7[%c1_17, %c0_18, %c0_19] : memref<3x1x32xf32, #tpu.memory_space<vmem>>, vector<1x1x32xf32>
    %23 = vector.shape_cast %22 : vector<1x1x32xf32> to vector<1x32xf32>
    %24 = vector.broadcast %23 : vector<1x32xf32> to vector<64x32xf32>
    %25 = arith.addf %21, %24 : vector<64x32xf32>
    %26 = arith.index_cast %9 : i32 to index
    %c0_20 = arith.constant 0 : index
    %27 = vector.load %arg14[%26, %c0_20] : memref<64x32xf32, #tpu.memory_space<vmem>>, vector<64x32xf32>
    tpu.vector_store %arg14[%26, %c0_20], %25 {strides = array<i32>} : memref<64x32xf32, #tpu.memory_space<vmem>>, vector<64x32xf32>,
    %c2 = arith.constant 2 : index
    %c0_21 = arith.constant 0 : index
    %c0_22 = arith.constant 0 : index
    %28 = vector.load %arg6[%c2, %c0_21, %c0_22] : memref<3x32x32xbf16, #tpu.memory_space<vmem>>, vector<1x32x32xbf16>
    %29 = vector.shape_cast %28 : vector<1x32x32xbf16> to vector<32x32xbf16>
    %cst_23 = arith.constant dense<0.000000e+00> : vector<64x32xf32>
    %30 = tpu.matmul %7, %29, %cst_23 {dimension_numbers = #tpu.dot_dimension_numbers<[1], [0], [0], [1], [0, 0, 1, 1], [], []>} : vector<64x32xbf16>, vector<32x32xbf16>, vector<64x32xf32> -> vector<64x32xf32>
    %c2_24 = arith.constant 2 : index
    %c0_25 = arith.constant 0 : index
    %c0_26 = arith.constant 0 : index
    %31 = vector.load %arg7[%c2_24, %c0_25, %c0_26] : memref<3x1x32xf32, #tpu.memory_space<vmem>>, vector<1x1x32xf32>
    %32 = vector.shape_cast %31 : vector<1x1x32xf32> to vector<1x32xf32>
    %33 = vector.broadcast %32 : vector<1x32xf32> to vector<64x32xf32>
    %34 = arith.addf %30, %33 : vector<64x32xf32>
    %35 = arith.index_cast %9 : i32 to index
    %c0_27 = arith.constant 0 : index
    %36 = vector.load %arg15[%35, %c0_27] : memref<64x32xf32, #tpu.memory_space<vmem>>, vector<64x32xf32>
    tpu.vector_store %arg15[%35, %c0_27], %34 {strides = array<i32>} : memref<64x32xf32, #tpu.memory_space<vmem>>, vector<64x32xf32>,
    %c0_i32 = arith.constant 0 : i32
    %37 = arith.cmpi eq, %arg1, %c0_i32 : i32
    %38 = arith.extui %37 : i1 to i32
    %c0_i32_28 = arith.constant 0 : i32
    %39 = arith.cmpi ne, %38, %c0_i32_28 : i32
    scf.if %39 {
      %c0_29 = arith.constant 0 : index
      %c0_30 = arith.constant 0 : index
      %c0_31 = arith.constant 0 : index
      %40 = vector.load %arg8[%c0_29, %c0_30, %c0_31] : memref<3x32x32xbf16, #tpu.memory_space<vmem>>, vector<1x32x32xbf16>
      %41 = vector.shape_cast %40 : vector<1x32x32xbf16> to vector<32x32xbf16>
      %c1_32 = arith.constant 1 : index
      %c0_33 = arith.constant 0 : index
      %c0_34 = arith.constant 0 : index
      %42 = vector.load %arg8[%c1_32, %c0_33, %c0_34] : memref<3x32x32xbf16, #tpu.memory_space<vmem>>, vector<1x32x32xbf16>
      %43 = vector.shape_cast %42 : vector<1x32x32xbf16> to vector<32x32xbf16>
      %c2_35 = arith.constant 2 : index
      %c0_36 = arith.constant 0 : index
      %c0_37 = arith.constant 0 : index
      %44 = vector.load %arg8[%c2_35, %c0_36, %c0_37] : memref<3x32x32xbf16, #tpu.memory_space<vmem>>, vector<1x32x32xbf16>
      %45 = vector.shape_cast %44 : vector<1x32x32xbf16> to vector<32x32xbf16>
      %c0_38 = arith.constant 0 : index
      %c0_39 = arith.constant 0 : index
      %c0_40 = arith.constant 0 : index
      %46 = vector.load %arg9[%c0_38, %c0_39, %c0_40] : memref<3x1x32xf32, #tpu.memory_space<vmem>>, vector<1x1x32xf32>
      %47 = vector.shape_cast %46 : vector<1x1x32xf32> to vector<1x32xf32>
      %c1_41 = arith.constant 1 : index
      %c0_42 = arith.constant 0 : index
      %c0_43 = arith.constant 0 : index
      %48 = vector.load %arg9[%c1_41, %c0_42, %c0_43] : memref<3x1x32xf32, #tpu.memory_space<vmem>>, vector<1x1x32xf32>
      %49 = vector.shape_cast %48 : vector<1x1x32xf32> to vector<1x32xf32>
      %c2_44 = arith.constant 2 : index
      %c0_45 = arith.constant 0 : index
      %c0_46 = arith.constant 0 : index
      %50 = vector.load %arg9[%c2_44, %c0_45, %c0_46] : memref<3x1x32xf32, #tpu.memory_space<vmem>>, vector<1x1x32xf32>
      %51 = vector.shape_cast %50 : vector<1x1x32xf32> to vector<1x32xf32>
      %c0_47 = arith.constant 0 : index
      %c0_48 = arith.constant 0 : index
      %52 = vector.load %arg10[%c0_47, %c0_48] : memref<1x32xf32, #tpu.memory_space<vmem>>, vector<1x32xf32>
      %c0_49 = arith.constant 0 : index
      %c0_50 = arith.constant 0 : index
      %53 = vector.load %arg11[%c0_49, %c0_50] : memref<1x1xf32, #tpu.memory_space<vmem>>, vector<1x1xf32>
      %54 = tpu.iota {dimensions = array<i32: 1>} : vector<8x8xi32>
      %cst_51 = arith.constant 0.000000e+00 : f32
      %55 = vector.broadcast %cst_51 : f32 to vector<8x32xf32>
      %cst_52 = arith.constant 0.000000e+00 : f32
      %56 = vector.broadcast %cst_52 : f32 to vector<8x8xf32>
      %c0_i32_53 = arith.constant 0 : i32
      %c8_i32 = arith.constant 8 : i32
      %57 = arith.muli %c0_i32_53, %c8_i32 : i32
      %58 = tpu.assume_multiple %57, 8 : i32
      %59 = arith.index_cast %58 : i32 to index
      %c0_54 = arith.constant 0 : index
      %60 = vector.load %arg13[%59, %c0_54] : memref<64x32xf32, #tpu.memory_space<vmem>>, vector<8x32xf32>
      %61 = arith.index_cast %58 : i32 to index
      %c0_55 = arith.constant 0 : index
      %62 = vector.load %arg14[%61, %c0_55] : memref<64x32xf32, #tpu.memory_space<vmem>>, vector<8x32xf32>
      %63 = arith.index_cast %58 : i32 to index
      %c0_56 = arith.constant 0 : index
      %64 = vector.load %arg15[%63, %c0_56] : memref<64x32xf32, #tpu.memory_space<vmem>>, vector<8x32xf32>
      %65 = arith.truncf %55 : vector<8x32xf32> to vector<8x32xbf16>
      %cst_57 = arith.constant dense<0.000000e+00> : vector<8x32xf32>
      %66 = tpu.matmul %65, %41, %cst_57 {dimension_numbers = #tpu.dot_dimension_numbers<[1], [0], [0], [1], [0, 0, 1, 1], [], []>} : vector<8x32xbf16>, vector<32x32xbf16>, vector<8x32xf32> -> vector<8x32xf32>
      %67 = vector.broadcast %47 : vector<1x32xf32> to vector<8x32xf32>
      %68 = arith.addf %66, %67 : vector<8x32xf32>
      %cst_58 = arith.constant dense<0.000000e+00> : vector<8x32xf32>
      %69 = tpu.matmul %65, %43, %cst_58 {dimension_numbers = #tpu.dot_dimension_numbers<[1], [0], [0], [1], [0, 0, 1, 1], [], []>} : vector<8x32xbf16>, vector<32x32xbf16>, vector<8x32xf32> -> vector<8x32xf32>
      %70 = vector.broadcast %49 : vector<1x32xf32> to vector<8x32xf32>
      %71 = arith.addf %69, %70 : vector<8x32xf32>
      %cst_59 = arith.constant dense<0.000000e+00> : vector<8x32xf32>
      %72 = tpu.matmul %65, %45, %cst_59 {dimension_numbers = #tpu.dot_dimension_numbers<[1], [0], [0], [1], [0, 0, 1, 1], [], []>} : vector<8x32xbf16>, vector<32x32xbf16>, vector<8x32xf32> -> vector<8x32xf32>
      %73 = vector.broadcast %51 : vector<1x32xf32> to vector<8x32xf32>
      %74 = arith.addf %72, %73 : vector<8x32xf32>
      %75 = arith.addf %60, %68 : vector<8x32xf32>
      %76 = arith.negf %75 : vector<8x32xf32>
      %77 = math.exp %76 : vector<8x32xf32>
      %cst_60 = arith.constant 1.000000e+00 : f32
      %78 = vector.broadcast %cst_60 : f32 to vector<8x32xf32>
      %79 = arith.addf %78, %77 : vector<8x32xf32>
      %80 = arith.divf %78, %79 : vector<8x32xf32>
      %81 = arith.addf %62, %71 : vector<8x32xf32>
      %82 = arith.negf %81 : vector<8x32xf32>
      %83 = math.exp %82 : vector<8x32xf32>
      %cst_61 = arith.constant 1.000000e+00 : f32
      %84 = vector.broadcast %cst_61 : f32 to vector<8x32xf32>
      %85 = arith.addf %84, %83 : vector<8x32xf32>
      %86 = arith.divf %84, %85 : vector<8x32xf32>
      %87 = arith.mulf %80, %74 : vector<8x32xf32>
      %88 = arith.addf %64, %87 : vector<8x32xf32>
      %89 = math.tanh %88 : vector<8x32xf32>
      %cst_62 = arith.constant 1.000000e+00 : f32
      %90 = vector.broadcast %cst_62 : f32 to vector<8x32xf32>
      %91 = arith.subf %90, %86 : vector<8x32xf32>
      %92 = arith.mulf %91, %89 : vector<8x32xf32>
      %93 = arith.mulf %86, %55 : vector<8x32xf32>
      %94 = arith.addf %92, %93 : vector<8x32xf32>
      %95 = vector.broadcast %52 : vector<1x32xf32> to vector<8x32xf32>
      %96 = arith.mulf %94, %95 : vector<8x32xf32>
      %cst_63 = arith.constant dense<0.000000e+00> : vector<8xf32>
      %97 = vector.multi_reduction <add>, %96, %cst_63 [1] : vector<8x32xf32> to vector<8xf32>
      %98 = vector.shape_cast %97 : vector<8xf32> to vector<8x1xf32>
      %99 = vector.broadcast %53 : vector<1x1xf32> to vector<8x1xf32>
      %100 = arith.addf %98, %99 : vector<8x1xf32>
      %101 = vector.broadcast %c0_i32_53 : i32 to vector<8x8xi32>
      %102 = arith.cmpi eq, %54, %101 : vector<8x8xi32>
      %cst_64 = arith.constant 0.000000e+00 : f32
      %103 = vector.shape_cast %100 : vector<8x1xf32> to vector<8x1xf32>
      %104 = vector.broadcast %103 : vector<8x1xf32> to vector<8x8xf32>
      %105 = vector.broadcast %cst_64 : f32 to vector<8x8xf32>
      %106 = arith.select %102, %104, %105 : vector<8x8xi1>, vector<8x8xf32>
      %107 = arith.addf %56, %106 : vector<8x8xf32>
      %c1_i32 = arith.constant 1 : i32
      %c8_i32_65 = arith.constant 8 : i32
      %108 = arith.muli %c1_i32, %c8_i32_65 : i32
      %109 = tpu.assume_multiple %108, 8 : i32
      %110 = arith.index_cast %109 : i32 to index
      %c0_66 = arith.constant 0 : index
      %111 = vector.load %arg13[%110, %c0_66] : memref<64x32xf32, #tpu.memory_space<vmem>>, vector<8x32xf32>
      %112 = arith.index_cast %109 : i32 to index
      %c0_67 = arith.constant 0 : index
      %113 = vector.load %arg14[%112, %c0_67] : memref<64x32xf32, #tpu.memory_space<vmem>>, vector<8x32xf32>
      %114 = arith.index_cast %109 : i32 to index
      %c0_68 = arith.constant 0 : index
      %115 = vector.load %arg15[%114, %c0_68] : memref<64x32xf32, #tpu.memory_space<vmem>>, vector<8x32xf32>
      %116 = arith.truncf %94 : vector<8x32xf32> to vector<8x32xbf16>
      %cst_69 = arith.constant dense<0.000000e+00> : vector<8x32xf32>
      %117 = tpu.matmul %116, %41, %cst_69 {dimension_numbers = #tpu.dot_dimension_numbers<[1], [0], [0], [1], [0, 0, 1, 1], [], []>} : vector<8x32xbf16>, vector<32x32xbf16>, vector<8x32xf32> -> vector<8x32xf32>
      %118 = vector.broadcast %47 : vector<1x32xf32> to vector<8x32xf32>
      %119 = arith.addf %117, %118 : vector<8x32xf32>
      %cst_70 = arith.constant dense<0.000000e+00> : vector<8x32xf32>
      %120 = tpu.matmul %116, %43, %cst_70 {dimension_numbers = #tpu.dot_dimension_numbers<[1], [0], [0], [1], [0, 0, 1, 1], [], []>} : vector<8x32xbf16>, vector<32x32xbf16>, vector<8x32xf32> -> vector<8x32xf32>
      %121 = vector.broadcast %49 : vector<1x32xf32> to vector<8x32xf32>
      %122 = arith.addf %120, %121 : vector<8x32xf32>
      %cst_71 = arith.constant dense<0.000000e+00> : vector<8x32xf32>
      %123 = tpu.matmul %116, %45, %cst_71 {dimension_numbers = #tpu.dot_dimension_numbers<[1], [0], [0], [1], [0, 0, 1, 1], [], []>} : vector<8x32xbf16>, vector<32x32xbf16>, vector<8x32xf32> -> vector<8x32xf32>
      %124 = vector.broadcast %51 : vector<1x32xf32> to vector<8x32xf32>
      %125 = arith.addf %123, %124 : vector<8x32xf32>
      %126 = arith.addf %111, %119 : vector<8x32xf32>
      %127 = arith.negf %126 : vector<8x32xf32>
      %128 = math.exp %127 : vector<8x32xf32>
      %cst_72 = arith.constant 1.000000e+00 : f32
      %129 = vector.broadcast %cst_72 : f32 to vector<8x32xf32>
      %130 = arith.addf %129, %128 : vector<8x32xf32>
      %131 = arith.divf %129, %130 : vector<8x32xf32>
      %132 = arith.addf %113, %122 : vector<8x32xf32>
      %133 = arith.negf %132 : vector<8x32xf32>
      %134 = math.exp %133 : vector<8x32xf32>
      %cst_73 = arith.constant 1.000000e+00 : f32
      %135 = vector.broadcast %cst_73 : f32 to vector<8x32xf32>
      %136 = arith.addf %135, %134 : vector<8x32xf32>
      %137 = arith.divf %135, %136 : vector<8x32xf32>
      %138 = arith.mulf %131, %125 : vector<8x32xf32>
      %139 = arith.addf %115, %138 : vector<8x32xf32>
      %140 = math.tanh %139 : vector<8x32xf32>
      %cst_74 = arith.constant 1.000000e+00 : f32
      %141 = vector.broadcast %cst_74 : f32 to vector<8x32xf32>
      %142 = arith.subf %141, %137 : vector<8x32xf32>
      %143 = arith.mulf %142, %140 : vector<8x32xf32>
      %144 = arith.mulf %137, %94 : vector<8x32xf32>
      %145 = arith.addf %143, %144 : vector<8x32xf32>
      %146 = vector.broadcast %52 : vector<1x32xf32> to vector<8x32xf32>
      %147 = arith.mulf %145, %146 : vector<8x32xf32>
      %cst_75 = arith.constant dense<0.000000e+00> : vector<8xf32>
      %148 = vector.multi_reduction <add>, %147, %cst_75 [1] : vector<8x32xf32> to vector<8xf32>
      %149 = vector.shape_cast %148 : vector<8xf32> to vector<8x1xf32>
      %150 = vector.broadcast %53 : vector<1x1xf32> to vector<8x1xf32>
      %151 = arith.addf %149, %150 : vector<8x1xf32>
      %152 = vector.broadcast %c1_i32 : i32 to vector<8x8xi32>
      %153 = arith.cmpi eq, %54, %152 : vector<8x8xi32>
      %cst_76 = arith.constant 0.000000e+00 : f32
      %154 = vector.shape_cast %151 : vector<8x1xf32> to vector<8x1xf32>
      %155 = vector.broadcast %154 : vector<8x1xf32> to vector<8x8xf32>
      %156 = vector.broadcast %cst_76 : f32 to vector<8x8xf32>
      %157 = arith.select %153, %155, %156 : vector<8x8xi1>, vector<8x8xf32>
      %158 = arith.addf %107, %157 : vector<8x8xf32>
      %c2_i32 = arith.constant 2 : i32
      %c8_i32_77 = arith.constant 8 : i32
      %159 = arith.muli %c2_i32, %c8_i32_77 : i32
      %160 = tpu.assume_multiple %159, 8 : i32
      %161 = arith.index_cast %160 : i32 to index
      %c0_78 = arith.constant 0 : index
      %162 = vector.load %arg13[%161, %c0_78] : memref<64x32xf32, #tpu.memory_space<vmem>>, vector<8x32xf32>
      %163 = arith.index_cast %160 : i32 to index
      %c0_79 = arith.constant 0 : index
      %164 = vector.load %arg14[%163, %c0_79] : memref<64x32xf32, #tpu.memory_space<vmem>>, vector<8x32xf32>
      %165 = arith.index_cast %160 : i32 to index
      %c0_80 = arith.constant 0 : index
      %166 = vector.load %arg15[%165, %c0_80] : memref<64x32xf32, #tpu.memory_space<vmem>>, vector<8x32xf32>
      %167 = arith.truncf %145 : vector<8x32xf32> to vector<8x32xbf16>
      %cst_81 = arith.constant dense<0.000000e+00> : vector<8x32xf32>
      %168 = tpu.matmul %167, %41, %cst_81 {dimension_numbers = #tpu.dot_dimension_numbers<[1], [0], [0], [1], [0, 0, 1, 1], [], []>} : vector<8x32xbf16>, vector<32x32xbf16>, vector<8x32xf32> -> vector<8x32xf32>
      %169 = vector.broadcast %47 : vector<1x32xf32> to vector<8x32xf32>
      %170 = arith.addf %168, %169 : vector<8x32xf32>
      %cst_82 = arith.constant dense<0.000000e+00> : vector<8x32xf32>
      %171 = tpu.matmul %167, %43, %cst_82 {dimension_numbers = #tpu.dot_dimension_numbers<[1], [0], [0], [1], [0, 0, 1, 1], [], []>} : vector<8x32xbf16>, vector<32x32xbf16>, vector<8x32xf32> -> vector<8x32xf32>
      %172 = vector.broadcast %49 : vector<1x32xf32> to vector<8x32xf32>
      %173 = arith.addf %171, %172 : vector<8x32xf32>
      %cst_83 = arith.constant dense<0.000000e+00> : vector<8x32xf32>
      %174 = tpu.matmul %167, %45, %cst_83 {dimension_numbers = #tpu.dot_dimension_numbers<[1], [0], [0], [1], [0, 0, 1, 1], [], []>} : vector<8x32xbf16>, vector<32x32xbf16>, vector<8x32xf32> -> vector<8x32xf32>
      %175 = vector.broadcast %51 : vector<1x32xf32> to vector<8x32xf32>
      %176 = arith.addf %174, %175 : vector<8x32xf32>
      %177 = arith.addf %162, %170 : vector<8x32xf32>
      %178 = arith.negf %177 : vector<8x32xf32>
      %179 = math.exp %178 : vector<8x32xf32>
      %cst_84 = arith.constant 1.000000e+00 : f32
      %180 = vector.broadcast %cst_84 : f32 to vector<8x32xf32>
      %181 = arith.addf %180, %179 : vector<8x32xf32>
      %182 = arith.divf %180, %181 : vector<8x32xf32>
      %183 = arith.addf %164, %173 : vector<8x32xf32>
      %184 = arith.negf %183 : vector<8x32xf32>
      %185 = math.exp %184 : vector<8x32xf32>
      %cst_85 = arith.constant 1.000000e+00 : f32
      %186 = vector.broadcast %cst_85 : f32 to vector<8x32xf32>
      %187 = arith.addf %186, %185 : vector<8x32xf32>
      %188 = arith.divf %186, %187 : vector<8x32xf32>
      %189 = arith.mulf %182, %176 : vector<8x32xf32>
      %190 = arith.addf %166, %189 : vector<8x32xf32>
      %191 = math.tanh %190 : vector<8x32xf32>
      %cst_86 = arith.constant 1.000000e+00 : f32
      %192 = vector.broadcast %cst_86 : f32 to vector<8x32xf32>
      %193 = arith.subf %192, %188 : vector<8x32xf32>
      %194 = arith.mulf %193, %191 : vector<8x32xf32>
      %195 = arith.mulf %188, %145 : vector<8x32xf32>
      %196 = arith.addf %194, %195 : vector<8x32xf32>
      %197 = vector.broadcast %52 : vector<1x32xf32> to vector<8x32xf32>
      %198 = arith.mulf %196, %197 : vector<8x32xf32>
      %cst_87 = arith.constant dense<0.000000e+00> : vector<8xf32>
      %199 = vector.multi_reduction <add>, %198, %cst_87 [1] : vector<8x32xf32> to vector<8xf32>
      %200 = vector.shape_cast %199 : vector<8xf32> to vector<8x1xf32>
      %201 = vector.broadcast %53 : vector<1x1xf32> to vector<8x1xf32>
      %202 = arith.addf %200, %201 : vector<8x1xf32>
      %203 = vector.broadcast %c2_i32 : i32 to vector<8x8xi32>
      %204 = arith.cmpi eq, %54, %203 : vector<8x8xi32>
      %cst_88 = arith.constant 0.000000e+00 : f32
      %205 = vector.shape_cast %202 : vector<8x1xf32> to vector<8x1xf32>
      %206 = vector.broadcast %205 : vector<8x1xf32> to vector<8x8xf32>
      %207 = vector.broadcast %cst_88 : f32 to vector<8x8xf32>
      %208 = arith.select %204, %206, %207 : vector<8x8xi1>, vector<8x8xf32>
      %209 = arith.addf %158, %208 : vector<8x8xf32>
      %c3_i32 = arith.constant 3 : i32
      %c8_i32_89 = arith.constant 8 : i32
      %210 = arith.muli %c3_i32, %c8_i32_89 : i32
      %211 = tpu.assume_multiple %210, 8 : i32
      %212 = arith.index_cast %211 : i32 to index
      %c0_90 = arith.constant 0 : index
      %213 = vector.load %arg13[%212, %c0_90] : memref<64x32xf32, #tpu.memory_space<vmem>>, vector<8x32xf32>
      %214 = arith.index_cast %211 : i32 to index
      %c0_91 = arith.constant 0 : index
      %215 = vector.load %arg14[%214, %c0_91] : memref<64x32xf32, #tpu.memory_space<vmem>>, vector<8x32xf32>
      %216 = arith.index_cast %211 : i32 to index
      %c0_92 = arith.constant 0 : index
      %217 = vector.load %arg15[%216, %c0_92] : memref<64x32xf32, #tpu.memory_space<vmem>>, vector<8x32xf32>
      %218 = arith.truncf %196 : vector<8x32xf32> to vector<8x32xbf16>
      %cst_93 = arith.constant dense<0.000000e+00> : vector<8x32xf32>
      %219 = tpu.matmul %218, %41, %cst_93 {dimension_numbers = #tpu.dot_dimension_numbers<[1], [0], [0], [1], [0, 0, 1, 1], [], []>} : vector<8x32xbf16>, vector<32x32xbf16>, vector<8x32xf32> -> vector<8x32xf32>
      %220 = vector.broadcast %47 : vector<1x32xf32> to vector<8x32xf32>
      %221 = arith.addf %219, %220 : vector<8x32xf32>
      %cst_94 = arith.constant dense<0.000000e+00> : vector<8x32xf32>
      %222 = tpu.matmul %218, %43, %cst_94 {dimension_numbers = #tpu.dot_dimension_numbers<[1], [0], [0], [1], [0, 0, 1, 1], [], []>} : vector<8x32xbf16>, vector<32x32xbf16>, vector<8x32xf32> -> vector<8x32xf32>
      %223 = vector.broadcast %49 : vector<1x32xf32> to vector<8x32xf32>
      %224 = arith.addf %222, %223 : vector<8x32xf32>
      %cst_95 = arith.constant dense<0.000000e+00> : vector<8x32xf32>
      %225 = tpu.matmul %218, %45, %cst_95 {dimension_numbers = #tpu.dot_dimension_numbers<[1], [0], [0], [1], [0, 0, 1, 1], [], []>} : vector<8x32xbf16>, vector<32x32xbf16>, vector<8x32xf32> -> vector<8x32xf32>
      %226 = vector.broadcast %51 : vector<1x32xf32> to vector<8x32xf32>
      %227 = arith.addf %225, %226 : vector<8x32xf32>
      %228 = arith.addf %213, %221 : vector<8x32xf32>
      %229 = arith.negf %228 : vector<8x32xf32>
      %230 = math.exp %229 : vector<8x32xf32>
      %cst_96 = arith.constant 1.000000e+00 : f32
      %231 = vector.broadcast %cst_96 : f32 to vector<8x32xf32>
      %232 = arith.addf %231, %230 : vector<8x32xf32>
      %233 = arith.divf %231, %232 : vector<8x32xf32>
      %234 = arith.addf %215, %224 : vector<8x32xf32>
      %235 = arith.negf %234 : vector<8x32xf32>
      %236 = math.exp %235 : vector<8x32xf32>
      %cst_97 = arith.constant 1.000000e+00 : f32
      %237 = vector.broadcast %cst_97 : f32 to vector<8x32xf32>
      %238 = arith.addf %237, %236 : vector<8x32xf32>
      %239 = arith.divf %237, %238 : vector<8x32xf32>
      %240 = arith.mulf %233, %227 : vector<8x32xf32>
      %241 = arith.addf %217, %240 : vector<8x32xf32>
      %242 = math.tanh %241 : vector<8x32xf32>
      %cst_98 = arith.constant 1.000000e+00 : f32
      %243 = vector.broadcast %cst_98 : f32 to vector<8x32xf32>
      %244 = arith.subf %243, %239 : vector<8x32xf32>
      %245 = arith.mulf %244, %242 : vector<8x32xf32>
      %246 = arith.mulf %239, %196 : vector<8x32xf32>
      %247 = arith.addf %245, %246 : vector<8x32xf32>
      %248 = vector.broadcast %52 : vector<1x32xf32> to vector<8x32xf32>
      %249 = arith.mulf %247, %248 : vector<8x32xf32>
      %cst_99 = arith.constant dense<0.000000e+00> : vector<8xf32>
      %250 = vector.multi_reduction <add>, %249, %cst_99 [1] : vector<8x32xf32> to vector<8xf32>
      %251 = vector.shape_cast %250 : vector<8xf32> to vector<8x1xf32>
      %252 = vector.broadcast %53 : vector<1x1xf32> to vector<8x1xf32>
      %253 = arith.addf %251, %252 : vector<8x1xf32>
      %254 = vector.broadcast %c3_i32 : i32 to vector<8x8xi32>
      %255 = arith.cmpi eq, %54, %254 : vector<8x8xi32>
      %cst_100 = arith.constant 0.000000e+00 : f32
      %256 = vector.shape_cast %253 : vector<8x1xf32> to vector<8x1xf32>
      %257 = vector.broadcast %256 : vector<8x1xf32> to vector<8x8xf32>
      %258 = vector.broadcast %cst_100 : f32 to vector<8x8xf32>
      %259 = arith.select %255, %257, %258 : vector<8x8xi1>, vector<8x8xf32>
      %260 = arith.addf %209, %259 : vector<8x8xf32>
      %c4_i32 = arith.constant 4 : i32
      %c8_i32_101 = arith.constant 8 : i32
      %261 = arith.muli %c4_i32, %c8_i32_101 : i32
      %262 = tpu.assume_multiple %261, 8 : i32
      %263 = arith.index_cast %262 : i32 to index
      %c0_102 = arith.constant 0 : index
      %264 = vector.load %arg13[%263, %c0_102] : memref<64x32xf32, #tpu.memory_space<vmem>>, vector<8x32xf32>
      %265 = arith.index_cast %262 : i32 to index
      %c0_103 = arith.constant 0 : index
      %266 = vector.load %arg14[%265, %c0_103] : memref<64x32xf32, #tpu.memory_space<vmem>>, vector<8x32xf32>
      %267 = arith.index_cast %262 : i32 to index
      %c0_104 = arith.constant 0 : index
      %268 = vector.load %arg15[%267, %c0_104] : memref<64x32xf32, #tpu.memory_space<vmem>>, vector<8x32xf32>
      %269 = arith.truncf %247 : vector<8x32xf32> to vector<8x32xbf16>
      %cst_105 = arith.constant dense<0.000000e+00> : vector<8x32xf32>
      %270 = tpu.matmul %269, %41, %cst_105 {dimension_numbers = #tpu.dot_dimension_numbers<[1], [0], [0], [1], [0, 0, 1, 1], [], []>} : vector<8x32xbf16>, vector<32x32xbf16>, vector<8x32xf32> -> vector<8x32xf32>
      %271 = vector.broadcast %47 : vector<1x32xf32> to vector<8x32xf32>
      %272 = arith.addf %270, %271 : vector<8x32xf32>
      %cst_106 = arith.constant dense<0.000000e+00> : vector<8x32xf32>
      %273 = tpu.matmul %269, %43, %cst_106 {dimension_numbers = #tpu.dot_dimension_numbers<[1], [0], [0], [1], [0, 0, 1, 1], [], []>} : vector<8x32xbf16>, vector<32x32xbf16>, vector<8x32xf32> -> vector<8x32xf32>
      %274 = vector.broadcast %49 : vector<1x32xf32> to vector<8x32xf32>
      %275 = arith.addf %273, %274 : vector<8x32xf32>
      %cst_107 = arith.constant dense<0.000000e+00> : vector<8x32xf32>
      %276 = tpu.matmul %269, %45, %cst_107 {dimension_numbers = #tpu.dot_dimension_numbers<[1], [0], [0], [1], [0, 0, 1, 1], [], []>} : vector<8x32xbf16>, vector<32x32xbf16>, vector<8x32xf32> -> vector<8x32xf32>
      %277 = vector.broadcast %51 : vector<1x32xf32> to vector<8x32xf32>
      %278 = arith.addf %276, %277 : vector<8x32xf32>
      %279 = arith.addf %264, %272 : vector<8x32xf32>
      %280 = arith.negf %279 : vector<8x32xf32>
      %281 = math.exp %280 : vector<8x32xf32>
      %cst_108 = arith.constant 1.000000e+00 : f32
      %282 = vector.broadcast %cst_108 : f32 to vector<8x32xf32>
      %283 = arith.addf %282, %281 : vector<8x32xf32>
      %284 = arith.divf %282, %283 : vector<8x32xf32>
      %285 = arith.addf %266, %275 : vector<8x32xf32>
      %286 = arith.negf %285 : vector<8x32xf32>
      %287 = math.exp %286 : vector<8x32xf32>
      %cst_109 = arith.constant 1.000000e+00 : f32
      %288 = vector.broadcast %cst_109 : f32 to vector<8x32xf32>
      %289 = arith.addf %288, %287 : vector<8x32xf32>
      %290 = arith.divf %288, %289 : vector<8x32xf32>
      %291 = arith.mulf %284, %278 : vector<8x32xf32>
      %292 = arith.addf %268, %291 : vector<8x32xf32>
      %293 = math.tanh %292 : vector<8x32xf32>
      %cst_110 = arith.constant 1.000000e+00 : f32
      %294 = vector.broadcast %cst_110 : f32 to vector<8x32xf32>
      %295 = arith.subf %294, %290 : vector<8x32xf32>
      %296 = arith.mulf %295, %293 : vector<8x32xf32>
      %297 = arith.mulf %290, %247 : vector<8x32xf32>
      %298 = arith.addf %296, %297 : vector<8x32xf32>
      %299 = vector.broadcast %52 : vector<1x32xf32> to vector<8x32xf32>
      %300 = arith.mulf %298, %299 : vector<8x32xf32>
      %cst_111 = arith.constant dense<0.000000e+00> : vector<8xf32>
      %301 = vector.multi_reduction <add>, %300, %cst_111 [1] : vector<8x32xf32> to vector<8xf32>
      %302 = vector.shape_cast %301 : vector<8xf32> to vector<8x1xf32>
      %303 = vector.broadcast %53 : vector<1x1xf32> to vector<8x1xf32>
      %304 = arith.addf %302, %303 : vector<8x1xf32>
      %305 = vector.broadcast %c4_i32 : i32 to vector<8x8xi32>
      %306 = arith.cmpi eq, %54, %305 : vector<8x8xi32>
      %cst_112 = arith.constant 0.000000e+00 : f32
      %307 = vector.shape_cast %304 : vector<8x1xf32> to vector<8x1xf32>
      %308 = vector.broadcast %307 : vector<8x1xf32> to vector<8x8xf32>
      %309 = vector.broadcast %cst_112 : f32 to vector<8x8xf32>
      %310 = arith.select %306, %308, %309 : vector<8x8xi1>, vector<8x8xf32>
      %311 = arith.addf %260, %310 : vector<8x8xf32>
      %c5_i32 = arith.constant 5 : i32
      %c8_i32_113 = arith.constant 8 : i32
      %312 = arith.muli %c5_i32, %c8_i32_113 : i32
      %313 = tpu.assume_multiple %312, 8 : i32
      %314 = arith.index_cast %313 : i32 to index
      %c0_114 = arith.constant 0 : index
      %315 = vector.load %arg13[%314, %c0_114] : memref<64x32xf32, #tpu.memory_space<vmem>>, vector<8x32xf32>
      %316 = arith.index_cast %313 : i32 to index
      %c0_115 = arith.constant 0 : index
      %317 = vector.load %arg14[%316, %c0_115] : memref<64x32xf32, #tpu.memory_space<vmem>>, vector<8x32xf32>
      %318 = arith.index_cast %313 : i32 to index
      %c0_116 = arith.constant 0 : index
      %319 = vector.load %arg15[%318, %c0_116] : memref<64x32xf32, #tpu.memory_space<vmem>>, vector<8x32xf32>
      %320 = arith.truncf %298 : vector<8x32xf32> to vector<8x32xbf16>
      %cst_117 = arith.constant dense<0.000000e+00> : vector<8x32xf32>
      %321 = tpu.matmul %320, %41, %cst_117 {dimension_numbers = #tpu.dot_dimension_numbers<[1], [0], [0], [1], [0, 0, 1, 1], [], []>} : vector<8x32xbf16>, vector<32x32xbf16>, vector<8x32xf32> -> vector<8x32xf32>
      %322 = vector.broadcast %47 : vector<1x32xf32> to vector<8x32xf32>
      %323 = arith.addf %321, %322 : vector<8x32xf32>
      %cst_118 = arith.constant dense<0.000000e+00> : vector<8x32xf32>
      %324 = tpu.matmul %320, %43, %cst_118 {dimension_numbers = #tpu.dot_dimension_numbers<[1], [0], [0], [1], [0, 0, 1, 1], [], []>} : vector<8x32xbf16>, vector<32x32xbf16>, vector<8x32xf32> -> vector<8x32xf32>
      %325 = vector.broadcast %49 : vector<1x32xf32> to vector<8x32xf32>
      %326 = arith.addf %324, %325 : vector<8x32xf32>
      %cst_119 = arith.constant dense<0.000000e+00> : vector<8x32xf32>
      %327 = tpu.matmul %320, %45, %cst_119 {dimension_numbers = #tpu.dot_dimension_numbers<[1], [0], [0], [1], [0, 0, 1, 1], [], []>} : vector<8x32xbf16>, vector<32x32xbf16>, vector<8x32xf32> -> vector<8x32xf32>
      %328 = vector.broadcast %51 : vector<1x32xf32> to vector<8x32xf32>
      %329 = arith.addf %327, %328 : vector<8x32xf32>
      %330 = arith.addf %315, %323 : vector<8x32xf32>
      %331 = arith.negf %330 : vector<8x32xf32>
      %332 = math.exp %331 : vector<8x32xf32>
      %cst_120 = arith.constant 1.000000e+00 : f32
      %333 = vector.broadcast %cst_120 : f32 to vector<8x32xf32>
      %334 = arith.addf %333, %332 : vector<8x32xf32>
      %335 = arith.divf %333, %334 : vector<8x32xf32>
      %336 = arith.addf %317, %326 : vector<8x32xf32>
      %337 = arith.negf %336 : vector<8x32xf32>
      %338 = math.exp %337 : vector<8x32xf32>
      %cst_121 = arith.constant 1.000000e+00 : f32
      %339 = vector.broadcast %cst_121 : f32 to vector<8x32xf32>
      %340 = arith.addf %339, %338 : vector<8x32xf32>
      %341 = arith.divf %339, %340 : vector<8x32xf32>
      %342 = arith.mulf %335, %329 : vector<8x32xf32>
      %343 = arith.addf %319, %342 : vector<8x32xf32>
      %344 = math.tanh %343 : vector<8x32xf32>
      %cst_122 = arith.constant 1.000000e+00 : f32
      %345 = vector.broadcast %cst_122 : f32 to vector<8x32xf32>
      %346 = arith.subf %345, %341 : vector<8x32xf32>
      %347 = arith.mulf %346, %344 : vector<8x32xf32>
      %348 = arith.mulf %341, %298 : vector<8x32xf32>
      %349 = arith.addf %347, %348 : vector<8x32xf32>
      %350 = vector.broadcast %52 : vector<1x32xf32> to vector<8x32xf32>
      %351 = arith.mulf %349, %350 : vector<8x32xf32>
      %cst_123 = arith.constant dense<0.000000e+00> : vector<8xf32>
      %352 = vector.multi_reduction <add>, %351, %cst_123 [1] : vector<8x32xf32> to vector<8xf32>
      %353 = vector.shape_cast %352 : vector<8xf32> to vector<8x1xf32>
      %354 = vector.broadcast %53 : vector<1x1xf32> to vector<8x1xf32>
      %355 = arith.addf %353, %354 : vector<8x1xf32>
      %356 = vector.broadcast %c5_i32 : i32 to vector<8x8xi32>
      %357 = arith.cmpi eq, %54, %356 : vector<8x8xi32>
      %cst_124 = arith.constant 0.000000e+00 : f32
      %358 = vector.shape_cast %355 : vector<8x1xf32> to vector<8x1xf32>
      %359 = vector.broadcast %358 : vector<8x1xf32> to vector<8x8xf32>
      %360 = vector.broadcast %cst_124 : f32 to vector<8x8xf32>
      %361 = arith.select %357, %359, %360 : vector<8x8xi1>, vector<8x8xf32>
      %362 = arith.addf %311, %361 : vector<8x8xf32>
      %c6_i32 = arith.constant 6 : i32
      %c8_i32_125 = arith.constant 8 : i32
      %363 = arith.muli %c6_i32, %c8_i32_125 : i32
      %364 = tpu.assume_multiple %363, 8 : i32
      %365 = arith.index_cast %364 : i32 to index
      %c0_126 = arith.constant 0 : index
      %366 = vector.load %arg13[%365, %c0_126] : memref<64x32xf32, #tpu.memory_space<vmem>>, vector<8x32xf32>
      %367 = arith.index_cast %364 : i32 to index
      %c0_127 = arith.constant 0 : index
      %368 = vector.load %arg14[%367, %c0_127] : memref<64x32xf32, #tpu.memory_space<vmem>>, vector<8x32xf32>
      %369 = arith.index_cast %364 : i32 to index
      %c0_128 = arith.constant 0 : index
      %370 = vector.load %arg15[%369, %c0_128] : memref<64x32xf32, #tpu.memory_space<vmem>>, vector<8x32xf32>
      %371 = arith.truncf %349 : vector<8x32xf32> to vector<8x32xbf16>
      %cst_129 = arith.constant dense<0.000000e+00> : vector<8x32xf32>
      %372 = tpu.matmul %371, %41, %cst_129 {dimension_numbers = #tpu.dot_dimension_numbers<[1], [0], [0], [1], [0, 0, 1, 1], [], []>} : vector<8x32xbf16>, vector<32x32xbf16>, vector<8x32xf32> -> vector<8x32xf32>
      %373 = vector.broadcast %47 : vector<1x32xf32> to vector<8x32xf32>
      %374 = arith.addf %372, %373 : vector<8x32xf32>
      %cst_130 = arith.constant dense<0.000000e+00> : vector<8x32xf32>
      %375 = tpu.matmul %371, %43, %cst_130 {dimension_numbers = #tpu.dot_dimension_numbers<[1], [0], [0], [1], [0, 0, 1, 1], [], []>} : vector<8x32xbf16>, vector<32x32xbf16>, vector<8x32xf32> -> vector<8x32xf32>
      %376 = vector.broadcast %49 : vector<1x32xf32> to vector<8x32xf32>
      %377 = arith.addf %375, %376 : vector<8x32xf32>
      %cst_131 = arith.constant dense<0.000000e+00> : vector<8x32xf32>
      %378 = tpu.matmul %371, %45, %cst_131 {dimension_numbers = #tpu.dot_dimension_numbers<[1], [0], [0], [1], [0, 0, 1, 1], [], []>} : vector<8x32xbf16>, vector<32x32xbf16>, vector<8x32xf32> -> vector<8x32xf32>
      %379 = vector.broadcast %51 : vector<1x32xf32> to vector<8x32xf32>
      %380 = arith.addf %378, %379 : vector<8x32xf32>
      %381 = arith.addf %366, %374 : vector<8x32xf32>
      %382 = arith.negf %381 : vector<8x32xf32>
      %383 = math.exp %382 : vector<8x32xf32>
      %cst_132 = arith.constant 1.000000e+00 : f32
      %384 = vector.broadcast %cst_132 : f32 to vector<8x32xf32>
      %385 = arith.addf %384, %383 : vector<8x32xf32>
      %386 = arith.divf %384, %385 : vector<8x32xf32>
      %387 = arith.addf %368, %377 : vector<8x32xf32>
      %388 = arith.negf %387 : vector<8x32xf32>
      %389 = math.exp %388 : vector<8x32xf32>
      %cst_133 = arith.constant 1.000000e+00 : f32
      %390 = vector.broadcast %cst_133 : f32 to vector<8x32xf32>
      %391 = arith.addf %390, %389 : vector<8x32xf32>
      %392 = arith.divf %390, %391 : vector<8x32xf32>
      %393 = arith.mulf %386, %380 : vector<8x32xf32>
      %394 = arith.addf %370, %393 : vector<8x32xf32>
      %395 = math.tanh %394 : vector<8x32xf32>
      %cst_134 = arith.constant 1.000000e+00 : f32
      %396 = vector.broadcast %cst_134 : f32 to vector<8x32xf32>
      %397 = arith.subf %396, %392 : vector<8x32xf32>
      %398 = arith.mulf %397, %395 : vector<8x32xf32>
      %399 = arith.mulf %392, %349 : vector<8x32xf32>
      %400 = arith.addf %398, %399 : vector<8x32xf32>
      %401 = vector.broadcast %52 : vector<1x32xf32> to vector<8x32xf32>
      %402 = arith.mulf %400, %401 : vector<8x32xf32>
      %cst_135 = arith.constant dense<0.000000e+00> : vector<8xf32>
      %403 = vector.multi_reduction <add>, %402, %cst_135 [1] : vector<8x32xf32> to vector<8xf32>
      %404 = vector.shape_cast %403 : vector<8xf32> to vector<8x1xf32>
      %405 = vector.broadcast %53 : vector<1x1xf32> to vector<8x1xf32>
      %406 = arith.addf %404, %405 : vector<8x1xf32>
      %407 = vector.broadcast %c6_i32 : i32 to vector<8x8xi32>
      %408 = arith.cmpi eq, %54, %407 : vector<8x8xi32>
      %cst_136 = arith.constant 0.000000e+00 : f32
      %409 = vector.shape_cast %406 : vector<8x1xf32> to vector<8x1xf32>
      %410 = vector.broadcast %409 : vector<8x1xf32> to vector<8x8xf32>
      %411 = vector.broadcast %cst_136 : f32 to vector<8x8xf32>
      %412 = arith.select %408, %410, %411 : vector<8x8xi1>, vector<8x8xf32>
      %413 = arith.addf %362, %412 : vector<8x8xf32>
      %c7_i32 = arith.constant 7 : i32
      %c8_i32_137 = arith.constant 8 : i32
      %414 = arith.muli %c7_i32, %c8_i32_137 : i32
      %415 = tpu.assume_multiple %414, 8 : i32
      %416 = arith.index_cast %415 : i32 to index
      %c0_138 = arith.constant 0 : index
      %417 = vector.load %arg13[%416, %c0_138] : memref<64x32xf32, #tpu.memory_space<vmem>>, vector<8x32xf32>
      %418 = arith.index_cast %415 : i32 to index
      %c0_139 = arith.constant 0 : index
      %419 = vector.load %arg14[%418, %c0_139] : memref<64x32xf32, #tpu.memory_space<vmem>>, vector<8x32xf32>
      %420 = arith.index_cast %415 : i32 to index
      %c0_140 = arith.constant 0 : index
      %421 = vector.load %arg15[%420, %c0_140] : memref<64x32xf32, #tpu.memory_space<vmem>>, vector<8x32xf32>
      %422 = arith.truncf %400 : vector<8x32xf32> to vector<8x32xbf16>
      %cst_141 = arith.constant dense<0.000000e+00> : vector<8x32xf32>
      %423 = tpu.matmul %422, %41, %cst_141 {dimension_numbers = #tpu.dot_dimension_numbers<[1], [0], [0], [1], [0, 0, 1, 1], [], []>} : vector<8x32xbf16>, vector<32x32xbf16>, vector<8x32xf32> -> vector<8x32xf32>
      %424 = vector.broadcast %47 : vector<1x32xf32> to vector<8x32xf32>
      %425 = arith.addf %423, %424 : vector<8x32xf32>
      %cst_142 = arith.constant dense<0.000000e+00> : vector<8x32xf32>
      %426 = tpu.matmul %422, %43, %cst_142 {dimension_numbers = #tpu.dot_dimension_numbers<[1], [0], [0], [1], [0, 0, 1, 1], [], []>} : vector<8x32xbf16>, vector<32x32xbf16>, vector<8x32xf32> -> vector<8x32xf32>
      %427 = vector.broadcast %49 : vector<1x32xf32> to vector<8x32xf32>
      %428 = arith.addf %426, %427 : vector<8x32xf32>
      %cst_143 = arith.constant dense<0.000000e+00> : vector<8x32xf32>
      %429 = tpu.matmul %422, %45, %cst_143 {dimension_numbers = #tpu.dot_dimension_numbers<[1], [0], [0], [1], [0, 0, 1, 1], [], []>} : vector<8x32xbf16>, vector<32x32xbf16>, vector<8x32xf32> -> vector<8x32xf32>
      %430 = vector.broadcast %51 : vector<1x32xf32> to vector<8x32xf32>
      %431 = arith.addf %429, %430 : vector<8x32xf32>
      %432 = arith.addf %417, %425 : vector<8x32xf32>
      %433 = arith.negf %432 : vector<8x32xf32>
      %434 = math.exp %433 : vector<8x32xf32>
      %cst_144 = arith.constant 1.000000e+00 : f32
      %435 = vector.broadcast %cst_144 : f32 to vector<8x32xf32>
      %436 = arith.addf %435, %434 : vector<8x32xf32>
      %437 = arith.divf %435, %436 : vector<8x32xf32>
      %438 = arith.addf %419, %428 : vector<8x32xf32>
      %439 = arith.negf %438 : vector<8x32xf32>
      %440 = math.exp %439 : vector<8x32xf32>
      %cst_145 = arith.constant 1.000000e+00 : f32
      %441 = vector.broadcast %cst_145 : f32 to vector<8x32xf32>
      %442 = arith.addf %441, %440 : vector<8x32xf32>
      %443 = arith.divf %441, %442 : vector<8x32xf32>
      %444 = arith.mulf %437, %431 : vector<8x32xf32>
      %445 = arith.addf %421, %444 : vector<8x32xf32>
      %446 = math.tanh %445 : vector<8x32xf32>
      %cst_146 = arith.constant 1.000000e+00 : f32
      %447 = vector.broadcast %cst_146 : f32 to vector<8x32xf32>
      %448 = arith.subf %447, %443 : vector<8x32xf32>
      %449 = arith.mulf %448, %446 : vector<8x32xf32>
      %450 = arith.mulf %443, %400 : vector<8x32xf32>
      %451 = arith.addf %449, %450 : vector<8x32xf32>
      %452 = vector.broadcast %52 : vector<1x32xf32> to vector<8x32xf32>
      %453 = arith.mulf %451, %452 : vector<8x32xf32>
      %cst_147 = arith.constant dense<0.000000e+00> : vector<8xf32>
      %454 = vector.multi_reduction <add>, %453, %cst_147 [1] : vector<8x32xf32> to vector<8xf32>
      %455 = vector.shape_cast %454 : vector<8xf32> to vector<8x1xf32>
      %456 = vector.broadcast %53 : vector<1x1xf32> to vector<8x1xf32>
      %457 = arith.addf %455, %456 : vector<8x1xf32>
      %458 = vector.broadcast %c7_i32 : i32 to vector<8x8xi32>
      %459 = arith.cmpi eq, %54, %458 : vector<8x8xi32>
      %cst_148 = arith.constant 0.000000e+00 : f32
      %460 = vector.shape_cast %457 : vector<8x1xf32> to vector<8x1xf32>
      %461 = vector.broadcast %460 : vector<8x1xf32> to vector<8x8xf32>
      %462 = vector.broadcast %cst_148 : f32 to vector<8x8xf32>
      %463 = arith.select %459, %461, %462 : vector<8x8xi1>, vector<8x8xf32>
      %464 = arith.addf %413, %463 : vector<8x8xf32>
      %c8_i32_149 = arith.constant 8 : i32
      %c0_150 = arith.constant 0 : index
      %c0_151 = arith.constant 0 : index
      %465 = vector.load %arg2[%c0_150, %c0_151] : memref<8x1xi32, #tpu.memory_space<vmem>>, vector<8x1xi32>
      %466 = vector.broadcast %465 : vector<8x1xi32> to vector<8x8xi32>
      %467 = arith.cmpi slt, %54, %466 : vector<8x8xi32>
      %cst_152 = arith.constant 0.000000e+00 : f32
      %468 = vector.broadcast %cst_152 : f32 to vector<8x8xf32>
      %469 = arith.subf %468, %464 : vector<8x8xf32>
      %470 = math.exp %469 : vector<8x8xf32>
      %471 = arith.mulf %464, %470 : vector<8x8xf32>
      %cst_153 = arith.constant 0.000000e+00 : f32
      %472 = vector.broadcast %cst_153 : f32 to vector<8x8xf32>
      %473 = arith.select %467, %471, %472 : vector<8x8xi1>, vector<8x8xf32>
      %cst_154 = arith.constant 0.000000e+00 : f32
      %474 = vector.broadcast %cst_154 : f32 to vector<8x8xf32>
      %475 = arith.select %467, %470, %474 : vector<8x8xi1>, vector<8x8xf32>
      %cst_155 = arith.constant 0x7F800000 : f32
      %476 = vector.broadcast %cst_155 : f32 to vector<8x1xf32>
      %477 = vector.extract_strided_slice %464 {offsets = [0, 0], sizes = [8, 7], strides = [1, 1]} : vector<8x8xf32> to vector<8x7xf32>
      %478 = tpu.concatenate %476, %477 in 1 : vector<8x1xf32>, vector<8x7xf32> -> vector<8x8xf32>
      %479 = arith.minimumf %464, %478 : vector<8x8xf32>
      %c1_i32_156 = arith.constant 1 : i32
      %480 = vector.broadcast %c1_i32_156 : i32 to vector<8x8xi32>
      %481 = arith.addi %54, %480 : vector<8x8xi32>
      %482 = vector.broadcast %465 : vector<8x1xi32> to vector<8x8xi32>
      %483 = arith.cmpi slt, %481, %482 : vector<8x8xi32>
      %cst_157 = arith.constant 0.000000e+00 : f32
      %484 = vector.broadcast %cst_157 : f32 to vector<8x1xf32>
      %485 = vector.extract_strided_slice %471 {offsets = [0, 1], sizes = [8, 7], strides = [1, 1]} : vector<8x8xf32> to vector<8x7xf32>
      %486 = tpu.concatenate %485, %484 in 1 : vector<8x7xf32>, vector<8x1xf32> -> vector<8x8xf32>
      %cst_158 = arith.constant 0.000000e+00 : f32
      %487 = vector.broadcast %cst_158 : f32 to vector<8x8xf32>
      %488 = arith.select %483, %486, %487 : vector<8x8xi1>, vector<8x8xf32>
      %489 = arith.addf %473, %488 : vector<8x8xf32>
      %cst_159 = arith.constant 0.000000e+00 : f32
      %490 = vector.broadcast %cst_159 : f32 to vector<8x1xf32>
      %491 = vector.extract_strided_slice %470 {offsets = [0, 1], sizes = [8, 7], strides = [1, 1]} : vector<8x8xf32> to vector<8x7xf32>
      %492 = tpu.concatenate %491, %490 in 1 : vector<8x7xf32>, vector<8x1xf32> -> vector<8x8xf32>
      %cst_160 = arith.constant 0.000000e+00 : f32
      %493 = vector.broadcast %cst_160 : f32 to vector<8x8xf32>
      %494 = arith.select %483, %492, %493 : vector<8x8xi1>, vector<8x8xf32>
      %495 = arith.addf %475, %494 : vector<8x8xf32>
      %cst_161 = arith.constant 0x7F800000 : f32
      %496 = vector.broadcast %cst_161 : f32 to vector<8x2xf32>
      %497 = vector.extract_strided_slice %464 {offsets = [0, 0], sizes = [8, 6], strides = [1, 1]} : vector<8x8xf32> to vector<8x6xf32>
      %498 = tpu.concatenate %496, %497 in 1 : vector<8x2xf32>, vector<8x6xf32> -> vector<8x8xf32>
      %499 = arith.minimumf %479, %498 : vector<8x8xf32>
      %c2_i32_162 = arith.constant 2 : i32
      %500 = vector.broadcast %c2_i32_162 : i32 to vector<8x8xi32>
      %501 = arith.addi %54, %500 : vector<8x8xi32>
      %502 = vector.broadcast %465 : vector<8x1xi32> to vector<8x8xi32>
      %503 = arith.cmpi slt, %501, %502 : vector<8x8xi32>
      %cst_163 = arith.constant 0.000000e+00 : f32
      %504 = vector.broadcast %cst_163 : f32 to vector<8x2xf32>
      %505 = vector.extract_strided_slice %471 {offsets = [0, 2], sizes = [8, 6], strides = [1, 1]} : vector<8x8xf32> to vector<8x6xf32>
      %506 = tpu.concatenate %505, %504 in 1 : vector<8x6xf32>, vector<8x2xf32> -> vector<8x8xf32>
      %cst_164 = arith.constant 0.000000e+00 : f32
      %507 = vector.broadcast %cst_164 : f32 to vector<8x8xf32>
      %508 = arith.select %503, %506, %507 : vector<8x8xi1>, vector<8x8xf32>
      %509 = arith.addf %489, %508 : vector<8x8xf32>
      %cst_165 = arith.constant 0.000000e+00 : f32
      %510 = vector.broadcast %cst_165 : f32 to vector<8x2xf32>
      %511 = vector.extract_strided_slice %470 {offsets = [0, 2], sizes = [8, 6], strides = [1, 1]} : vector<8x8xf32> to vector<8x6xf32>
      %512 = tpu.concatenate %511, %510 in 1 : vector<8x6xf32>, vector<8x2xf32> -> vector<8x8xf32>
      %cst_166 = arith.constant 0.000000e+00 : f32
      %513 = vector.broadcast %cst_166 : f32 to vector<8x8xf32>
      %514 = arith.select %503, %512, %513 : vector<8x8xi1>, vector<8x8xf32>
      %515 = arith.addf %495, %514 : vector<8x8xf32>
      %cst_167 = arith.constant 0x7F800000 : f32
      %516 = vector.broadcast %cst_167 : f32 to vector<8x3xf32>
      %517 = vector.extract_strided_slice %464 {offsets = [0, 0], sizes = [8, 5], strides = [1, 1]} : vector<8x8xf32> to vector<8x5xf32>
      %518 = tpu.concatenate %516, %517 in 1 : vector<8x3xf32>, vector<8x5xf32> -> vector<8x8xf32>
      %519 = arith.minimumf %499, %518 : vector<8x8xf32>
      %c3_i32_168 = arith.constant 3 : i32
      %520 = vector.broadcast %c3_i32_168 : i32 to vector<8x8xi32>
      %521 = arith.addi %54, %520 : vector<8x8xi32>
      %522 = vector.broadcast %465 : vector<8x1xi32> to vector<8x8xi32>
      %523 = arith.cmpi slt, %521, %522 : vector<8x8xi32>
      %cst_169 = arith.constant 0.000000e+00 : f32
      %524 = vector.broadcast %cst_169 : f32 to vector<8x3xf32>
      %525 = vector.extract_strided_slice %471 {offsets = [0, 3], sizes = [8, 5], strides = [1, 1]} : vector<8x8xf32> to vector<8x5xf32>
      %526 = tpu.concatenate %525, %524 in 1 : vector<8x5xf32>, vector<8x3xf32> -> vector<8x8xf32>
      %cst_170 = arith.constant 0.000000e+00 : f32
      %527 = vector.broadcast %cst_170 : f32 to vector<8x8xf32>
      %528 = arith.select %523, %526, %527 : vector<8x8xi1>, vector<8x8xf32>
      %529 = arith.addf %509, %528 : vector<8x8xf32>
      %cst_171 = arith.constant 0.000000e+00 : f32
      %530 = vector.broadcast %cst_171 : f32 to vector<8x3xf32>
      %531 = vector.extract_strided_slice %470 {offsets = [0, 3], sizes = [8, 5], strides = [1, 1]} : vector<8x8xf32> to vector<8x5xf32>
      %532 = tpu.concatenate %531, %530 in 1 : vector<8x5xf32>, vector<8x3xf32> -> vector<8x8xf32>
      %cst_172 = arith.constant 0.000000e+00 : f32
      %533 = vector.broadcast %cst_172 : f32 to vector<8x8xf32>
      %534 = arith.select %523, %532, %533 : vector<8x8xi1>, vector<8x8xf32>
      %535 = arith.addf %515, %534 : vector<8x8xf32>
      %cst_173 = arith.constant 0x7F800000 : f32
      %536 = vector.broadcast %cst_173 : f32 to vector<8x4xf32>
      %537 = vector.extract_strided_slice %464 {offsets = [0, 0], sizes = [8, 4], strides = [1, 1]} : vector<8x8xf32> to vector<8x4xf32>
      %538 = tpu.concatenate %536, %537 in 1 : vector<8x4xf32>, vector<8x4xf32> -> vector<8x8xf32>
      %539 = arith.minimumf %519, %538 : vector<8x8xf32>
      %c4_i32_174 = arith.constant 4 : i32
      %540 = vector.broadcast %c4_i32_174 : i32 to vector<8x8xi32>
      %541 = arith.addi %54, %540 : vector<8x8xi32>
      %542 = vector.broadcast %465 : vector<8x1xi32> to vector<8x8xi32>
      %543 = arith.cmpi slt, %541, %542 : vector<8x8xi32>
      %cst_175 = arith.constant 0.000000e+00 : f32
      %544 = vector.broadcast %cst_175 : f32 to vector<8x4xf32>
      %545 = vector.extract_strided_slice %471 {offsets = [0, 4], sizes = [8, 4], strides = [1, 1]} : vector<8x8xf32> to vector<8x4xf32>
      %546 = tpu.concatenate %545, %544 in 1 : vector<8x4xf32>, vector<8x4xf32> -> vector<8x8xf32>
      %cst_176 = arith.constant 0.000000e+00 : f32
      %547 = vector.broadcast %cst_176 : f32 to vector<8x8xf32>
      %548 = arith.select %543, %546, %547 : vector<8x8xi1>, vector<8x8xf32>
      %549 = arith.addf %529, %548 : vector<8x8xf32>
      %cst_177 = arith.constant 0.000000e+00 : f32
      %550 = vector.broadcast %cst_177 : f32 to vector<8x4xf32>
      %551 = vector.extract_strided_slice %470 {offsets = [0, 4], sizes = [8, 4], strides = [1, 1]} : vector<8x8xf32> to vector<8x4xf32>
      %552 = tpu.concatenate %551, %550 in 1 : vector<8x4xf32>, vector<8x4xf32> -> vector<8x8xf32>
      %cst_178 = arith.constant 0.000000e+00 : f32
      %553 = vector.broadcast %cst_178 : f32 to vector<8x8xf32>
      %554 = arith.select %543, %552, %553 : vector<8x8xi1>, vector<8x8xf32>
      %555 = arith.addf %535, %554 : vector<8x8xf32>
      %cst_179 = arith.constant 0x7F800000 : f32
      %556 = vector.broadcast %cst_179 : f32 to vector<8x5xf32>
      %557 = vector.extract_strided_slice %464 {offsets = [0, 0], sizes = [8, 3], strides = [1, 1]} : vector<8x8xf32> to vector<8x3xf32>
      %558 = tpu.concatenate %556, %557 in 1 : vector<8x5xf32>, vector<8x3xf32> -> vector<8x8xf32>
      %559 = arith.minimumf %539, %558 : vector<8x8xf32>
      %c5_i32_180 = arith.constant 5 : i32
      %560 = vector.broadcast %c5_i32_180 : i32 to vector<8x8xi32>
      %561 = arith.addi %54, %560 : vector<8x8xi32>
      %562 = vector.broadcast %465 : vector<8x1xi32> to vector<8x8xi32>
      %563 = arith.cmpi slt, %561, %562 : vector<8x8xi32>
      %cst_181 = arith.constant 0.000000e+00 : f32
      %564 = vector.broadcast %cst_181 : f32 to vector<8x5xf32>
      %565 = vector.extract_strided_slice %471 {offsets = [0, 5], sizes = [8, 3], strides = [1, 1]} : vector<8x8xf32> to vector<8x3xf32>
      %566 = tpu.concatenate %565, %564 in 1 : vector<8x3xf32>, vector<8x5xf32> -> vector<8x8xf32>
      %cst_182 = arith.constant 0.000000e+00 : f32
      %567 = vector.broadcast %cst_182 : f32 to vector<8x8xf32>
      %568 = arith.select %563, %566, %567 : vector<8x8xi1>, vector<8x8xf32>
      %569 = arith.addf %549, %568 : vector<8x8xf32>
      %cst_183 = arith.constant 0.000000e+00 : f32
      %570 = vector.broadcast %cst_183 : f32 to vector<8x5xf32>
      %571 = vector.extract_strided_slice %470 {offsets = [0, 5], sizes = [8, 3], strides = [1, 1]} : vector<8x8xf32> to vector<8x3xf32>
      %572 = tpu.concatenate %571, %570 in 1 : vector<8x3xf32>, vector<8x5xf32> -> vector<8x8xf32>
      %cst_184 = arith.constant 0.000000e+00 : f32
      %573 = vector.broadcast %cst_184 : f32 to vector<8x8xf32>
      %574 = arith.select %563, %572, %573 : vector<8x8xi1>, vector<8x8xf32>
      %575 = arith.addf %555, %574 : vector<8x8xf32>
      %cst_185 = arith.constant 0x7F800000 : f32
      %576 = vector.broadcast %cst_185 : f32 to vector<8x6xf32>
      %577 = vector.extract_strided_slice %464 {offsets = [0, 0], sizes = [8, 2], strides = [1, 1]} : vector<8x8xf32> to vector<8x2xf32>
      %578 = tpu.concatenate %576, %577 in 1 : vector<8x6xf32>, vector<8x2xf32> -> vector<8x8xf32>
      %579 = arith.minimumf %559, %578 : vector<8x8xf32>
      %c6_i32_186 = arith.constant 6 : i32
      %580 = vector.broadcast %c6_i32_186 : i32 to vector<8x8xi32>
      %581 = arith.addi %54, %580 : vector<8x8xi32>
      %582 = vector.broadcast %465 : vector<8x1xi32> to vector<8x8xi32>
      %583 = arith.cmpi slt, %581, %582 : vector<8x8xi32>
      %cst_187 = arith.constant 0.000000e+00 : f32
      %584 = vector.broadcast %cst_187 : f32 to vector<8x6xf32>
      %585 = vector.extract_strided_slice %471 {offsets = [0, 6], sizes = [8, 2], strides = [1, 1]} : vector<8x8xf32> to vector<8x2xf32>
      %586 = tpu.concatenate %585, %584 in 1 : vector<8x2xf32>, vector<8x6xf32> -> vector<8x8xf32>
      %cst_188 = arith.constant 0.000000e+00 : f32
      %587 = vector.broadcast %cst_188 : f32 to vector<8x8xf32>
      %588 = arith.select %583, %586, %587 : vector<8x8xi1>, vector<8x8xf32>
      %589 = arith.addf %569, %588 : vector<8x8xf32>
      %cst_189 = arith.constant 0.000000e+00 : f32
      %590 = vector.broadcast %cst_189 : f32 to vector<8x6xf32>
      %591 = vector.extract_strided_slice %470 {offsets = [0, 6], sizes = [8, 2], strides = [1, 1]} : vector<8x8xf32> to vector<8x2xf32>
      %592 = tpu.concatenate %591, %590 in 1 : vector<8x2xf32>, vector<8x6xf32> -> vector<8x8xf32>
      %cst_190 = arith.constant 0.000000e+00 : f32
      %593 = vector.broadcast %cst_190 : f32 to vector<8x8xf32>
      %594 = arith.select %583, %592, %593 : vector<8x8xi1>, vector<8x8xf32>
      %595 = arith.addf %575, %594 : vector<8x8xf32>
      %cst_191 = arith.constant 0x7F800000 : f32
      %596 = vector.broadcast %cst_191 : f32 to vector<8x7xf32>
      %597 = vector.extract_strided_slice %464 {offsets = [0, 0], sizes = [8, 1], strides = [1, 1]} : vector<8x8xf32> to vector<8x1xf32>
      %598 = tpu.concatenate %596, %597 in 1 : vector<8x7xf32>, vector<8x1xf32> -> vector<8x8xf32>
      %599 = arith.minimumf %579, %598 : vector<8x8xf32>
      %c7_i32_192 = arith.constant 7 : i32
      %600 = vector.broadcast %c7_i32_192 : i32 to vector<8x8xi32>
      %601 = arith.addi %54, %600 : vector<8x8xi32>
      %602 = vector.broadcast %465 : vector<8x1xi32> to vector<8x8xi32>
      %603 = arith.cmpi slt, %601, %602 : vector<8x8xi32>
      %cst_193 = arith.constant 0.000000e+00 : f32
      %604 = vector.broadcast %cst_193 : f32 to vector<8x7xf32>
      %605 = vector.extract_strided_slice %471 {offsets = [0, 7], sizes = [8, 1], strides = [1, 1]} : vector<8x8xf32> to vector<8x1xf32>
      %606 = tpu.concatenate %605, %604 in 1 : vector<8x1xf32>, vector<8x7xf32> -> vector<8x8xf32>
      %cst_194 = arith.constant 0.000000e+00 : f32
      %607 = vector.broadcast %cst_194 : f32 to vector<8x8xf32>
      %608 = arith.select %603, %606, %607 : vector<8x8xi1>, vector<8x8xf32>
      %609 = arith.addf %589, %608 : vector<8x8xf32>
      %cst_195 = arith.constant 0.000000e+00 : f32
      %610 = vector.broadcast %cst_195 : f32 to vector<8x7xf32>
      %611 = vector.extract_strided_slice %470 {offsets = [0, 7], sizes = [8, 1], strides = [1, 1]} : vector<8x8xf32> to vector<8x1xf32>
      %612 = tpu.concatenate %611, %610 in 1 : vector<8x1xf32>, vector<8x7xf32> -> vector<8x8xf32>
      %cst_196 = arith.constant 0.000000e+00 : f32
      %613 = vector.broadcast %cst_196 : f32 to vector<8x8xf32>
      %614 = arith.select %603, %612, %613 : vector<8x8xi1>, vector<8x8xf32>
      %615 = arith.addf %595, %614 : vector<8x8xf32>
      %cst_197 = arith.constant 0x7F800000 : f32
      %616 = vector.broadcast %cst_197 : f32 to vector<8x8xf32>
      %617 = arith.minimumf %599, %616 : vector<8x8xf32>
      %c8_i32_198 = arith.constant 8 : i32
      %618 = vector.broadcast %c8_i32_198 : i32 to vector<8x8xi32>
      %619 = arith.addi %54, %618 : vector<8x8xi32>
      %620 = vector.broadcast %465 : vector<8x1xi32> to vector<8x8xi32>
      %621 = arith.cmpi slt, %619, %620 : vector<8x8xi32>
      %cst_199 = arith.constant 0.000000e+00 : f32
      %622 = vector.broadcast %cst_199 : f32 to vector<8x8xf32>
      %cst_200 = arith.constant 0.000000e+00 : f32
      %623 = vector.broadcast %cst_200 : f32 to vector<8x8xf32>
      %624 = arith.select %621, %622, %623 : vector<8x8xi1>, vector<8x8xf32>
      %625 = arith.addf %609, %624 : vector<8x8xf32>
      %cst_201 = arith.constant 0.000000e+00 : f32
      %626 = vector.broadcast %cst_201 : f32 to vector<8x8xf32>
      %cst_202 = arith.constant 0.000000e+00 : f32
      %627 = vector.broadcast %cst_202 : f32 to vector<8x8xf32>
      %628 = arith.select %621, %626, %627 : vector<8x8xi1>, vector<8x8xf32>
      %629 = arith.addf %615, %628 : vector<8x8xf32>
      %cst_203 = arith.constant 0x7F800000 : f32
      %630 = vector.broadcast %cst_203 : f32 to vector<8x8xf32>
      %631 = arith.minimumf %617, %630 : vector<8x8xf32>
      %c9_i32 = arith.constant 9 : i32
      %632 = vector.broadcast %c9_i32 : i32 to vector<8x8xi32>
      %633 = arith.addi %54, %632 : vector<8x8xi32>
      %634 = vector.broadcast %465 : vector<8x1xi32> to vector<8x8xi32>
      %635 = arith.cmpi slt, %633, %634 : vector<8x8xi32>
      %cst_204 = arith.constant 0.000000e+00 : f32
      %636 = vector.broadcast %cst_204 : f32 to vector<8x8xf32>
      %cst_205 = arith.constant 0.000000e+00 : f32
      %637 = vector.broadcast %cst_205 : f32 to vector<8x8xf32>
      %638 = arith.select %635, %636, %637 : vector<8x8xi1>, vector<8x8xf32>
      %639 = arith.addf %625, %638 : vector<8x8xf32>
      %cst_206 = arith.constant 0.000000e+00 : f32
      %640 = vector.broadcast %cst_206 : f32 to vector<8x8xf32>
      %cst_207 = arith.constant 0.000000e+00 : f32
      %641 = vector.broadcast %cst_207 : f32 to vector<8x8xf32>
      %642 = arith.select %635, %640, %641 : vector<8x8xi1>, vector<8x8xf32>
      %643 = arith.addf %629, %642 : vector<8x8xf32>
      %cst_208 = arith.constant 0x7F800000 : f32
      %644 = vector.broadcast %cst_208 : f32 to vector<8x8xf32>
      %645 = arith.minimumf %631, %644 : vector<8x8xf32>
      %c10_i32 = arith.constant 10 : i32
      %646 = vector.broadcast %c10_i32 : i32 to vector<8x8xi32>
      %647 = arith.addi %54, %646 : vector<8x8xi32>
      %648 = vector.broadcast %465 : vector<8x1xi32> to vector<8x8xi32>
      %649 = arith.cmpi slt, %647, %648 : vector<8x8xi32>
      %cst_209 = arith.constant 0.000000e+00 : f32
      %650 = vector.broadcast %cst_209 : f32 to vector<8x8xf32>
      %cst_210 = arith.constant 0.000000e+00 : f32
      %651 = vector.broadcast %cst_210 : f32 to vector<8x8xf32>
      %652 = arith.select %649, %650, %651 : vector<8x8xi1>, vector<8x8xf32>
      %653 = arith.addf %639, %652 : vector<8x8xf32>
      %cst_211 = arith.constant 0.000000e+00 : f32
      %654 = vector.broadcast %cst_211 : f32 to vector<8x8xf32>
      %cst_212 = arith.constant 0.000000e+00 : f32
      %655 = vector.broadcast %cst_212 : f32 to vector<8x8xf32>
      %656 = arith.select %649, %654, %655 : vector<8x8xi1>, vector<8x8xf32>
      %657 = arith.addf %643, %656 : vector<8x8xf32>
      %cst_213 = arith.constant 0x7F800000 : f32
      %658 = vector.broadcast %cst_213 : f32 to vector<8x8xf32>
      %659 = arith.minimumf %645, %658 : vector<8x8xf32>
      %c11_i32 = arith.constant 11 : i32
      %660 = vector.broadcast %c11_i32 : i32 to vector<8x8xi32>
      %661 = arith.addi %54, %660 : vector<8x8xi32>
      %662 = vector.broadcast %465 : vector<8x1xi32> to vector<8x8xi32>
      %663 = arith.cmpi slt, %661, %662 : vector<8x8xi32>
      %cst_214 = arith.constant 0.000000e+00 : f32
      %664 = vector.broadcast %cst_214 : f32 to vector<8x8xf32>
      %cst_215 = arith.constant 0.000000e+00 : f32
      %665 = vector.broadcast %cst_215 : f32 to vector<8x8xf32>
      %666 = arith.select %663, %664, %665 : vector<8x8xi1>, vector<8x8xf32>
      %667 = arith.addf %653, %666 : vector<8x8xf32>
      %cst_216 = arith.constant 0.000000e+00 : f32
      %668 = vector.broadcast %cst_216 : f32 to vector<8x8xf32>
      %cst_217 = arith.constant 0.000000e+00 : f32
      %669 = vector.broadcast %cst_217 : f32 to vector<8x8xf32>
      %670 = arith.select %663, %668, %669 : vector<8x8xi1>, vector<8x8xf32>
      %671 = arith.addf %657, %670 : vector<8x8xf32>
      %cst_218 = arith.constant 0.000000e+00 : f32
      %672 = vector.broadcast %cst_218 : f32 to vector<8x8xf32>
      %673 = arith.cmpf ogt, %671, %672 : vector<8x8xf32>
      %cst_219 = arith.constant 1.000000e+00 : f32
      %674 = vector.broadcast %cst_219 : f32 to vector<8x8xf32>
      %675 = arith.select %673, %671, %674 : vector<8x8xi1>, vector<8x8xf32>
      %676 = arith.divf %667, %675 : vector<8x8xf32>
      %cst_220 = arith.constant 5.000000e-01 : f32
      %677 = vector.broadcast %cst_220 : f32 to vector<8x8xf32>
      %678 = arith.mulf %677, %676 : vector<8x8xf32>
      %cst_221 = arith.constant 5.000000e-01 : f32
      %679 = vector.broadcast %cst_221 : f32 to vector<8x8xf32>
      %680 = arith.mulf %679, %659 : vector<8x8xf32>
      %681 = arith.addf %678, %680 : vector<8x8xf32>
      %c1_i32_222 = arith.constant 1 : i32
      %682 = vector.broadcast %c1_i32_222 : i32 to vector<8x1xi32>
      %683 = arith.maxsi %465, %682 : vector<8x1xi32>
      %684 = arith.sitofp %683 : vector<8x1xi32> to vector<8x1xf32>
      %cst_223 = arith.constant 0.000000e+00 : f32
      %685 = vector.broadcast %cst_223 : f32 to vector<8x8xf32>
      %686 = arith.select %467, %681, %685 : vector<8x8xi1>, vector<8x8xf32>
      %cst_224 = arith.constant dense<0.000000e+00> : vector<8xf32>
      %687 = vector.multi_reduction <add>, %686, %cst_224 [1] : vector<8x8xf32> to vector<8xf32>
      %688 = vector.shape_cast %687 : vector<8xf32> to vector<8x1xf32>
      %689 = arith.divf %688, %684 : vector<8x1xf32>
      %c0_225 = arith.constant 0 : index
      %c0_226 = arith.constant 0 : index
      %690 = vector.load %arg12[%c0_225, %c0_226] : memref<8x1xf32, #tpu.memory_space<vmem>>, vector<8x1xf32>
      tpu.vector_store %arg12[%c0_225, %c0_226], %689 {strides = array<i32>} : memref<8x1xf32, #tpu.memory_space<vmem>>, vector<8x1xf32>,
    } else {
    }
    return
  }
  func.func @transform_0(%arg0: i32, %arg1: i32) -> (i32, i32) {
    %c0_i32 = arith.constant 0 : i32
    %c0_i32_0 = arith.constant 0 : i32
    return %arg0, %c0_i32 : i32, i32
  }
  func.func @transform_1(%arg0: i32, %arg1: i32) -> (i32, i32, i32) {
    %c0_i32 = arith.constant 0 : i32
    %c0_i32_0 = arith.constant 0 : i32
    return %arg0, %arg1, %c0_i32 : i32, i32, i32
  }
  func.func @transform_2(%arg0: i32, %arg1: i32) -> (i32, i32) {
    %c0_i32 = arith.constant 0 : i32
    %c0_i32_0 = arith.constant 0 : i32
    %c0_i32_1 = arith.constant 0 : i32
    return %c0_i32, %c0_i32_0 : i32, i32
  }
  func.func @transform_3(%arg0: i32, %arg1: i32) -> (i32, i32) {
    %c0_i32 = arith.constant 0 : i32
    %c0_i32_0 = arith.constant 0 : i32
    %c0_i32_1 = arith.constant 0 : i32
    return %c0_i32, %c0_i32_0 : i32, i32
  }
  func.func @transform_4(%arg0: i32, %arg1: i32) -> (i32, i32, i32) {
    %c0_i32 = arith.constant 0 : i32
    %c0_i32_0 = arith.constant 0 : i32
    %c0_i32_1 = arith.constant 0 : i32
    %c0_i32_2 = arith.constant 0 : i32
    return %c0_i32, %c0_i32_0, %c0_i32_1 : i32, i32, i32
  }
  func.func @transform_5(%arg0: i32, %arg1: i32) -> (i32, i32, i32) {
    %c0_i32 = arith.constant 0 : i32
    %c0_i32_0 = arith.constant 0 : i32
    %c0_i32_1 = arith.constant 0 : i32
    %c0_i32_2 = arith.constant 0 : i32
    return %c0_i32, %c0_i32_0, %c0_i32_1 : i32, i32, i32
  }
  func.func @transform_6(%arg0: i32, %arg1: i32) -> (i32, i32, i32) {
    %c0_i32 = arith.constant 0 : i32
    %c0_i32_0 = arith.constant 0 : i32
    %c0_i32_1 = arith.constant 0 : i32
    %c0_i32_2 = arith.constant 0 : i32
    return %c0_i32, %c0_i32_0, %c0_i32_1 : i32, i32, i32
  }
  func.func @transform_7(%arg0: i32, %arg1: i32) -> (i32, i32, i32) {
    %c0_i32 = arith.constant 0 : i32
    %c0_i32_0 = arith.constant 0 : i32
    %c0_i32_1 = arith.constant 0 : i32
    %c0_i32_2 = arith.constant 0 : i32
    return %c0_i32, %c0_i32_0, %c0_i32_1 : i32, i32, i32
  }
  func.func @transform_8(%arg0: i32, %arg1: i32) -> (i32, i32) {
    %c0_i32 = arith.constant 0 : i32
    %c0_i32_0 = arith.constant 0 : i32
    %c0_i32_1 = arith.constant 0 : i32
    return %c0_i32, %c0_i32_0 : i32, i32
  }
  func.func @transform_9(%arg0: i32, %arg1: i32) -> (i32, i32) {
    %c0_i32 = arith.constant 0 : i32
    %c0_i32_0 = arith.constant 0 : i32
    %c0_i32_1 = arith.constant 0 : i32
    return %c0_i32, %c0_i32_0 : i32, i32
  }
  func.func @transform_10(%arg0: i32, %arg1: i32) -> (i32, i32) {
    %c0_i32 = arith.constant 0 : i32
    %c0_i32_0 = arith.constant 0 : i32
    return %arg0, %c0_i32 : i32, i32
  }
}

</mosaic_0001>

<bundles_post_ra>
// kernel: tpu_custom_call.1
= control target key start
LH: loop header
LB: loop body
LE: loop exit
PB: predicated region body
PF: predicated region fallthrough
CT: control target
= control target key end

     0   :  { %s3310_s0 = inlined_call_operand.vmem [shape: s32[8,1], index: 0, kind: input, shape index: {}]   ;;  %s3311_s1 = inlined_call_operand.hbm [shape: bf16[1,64,64], index: 1, kind: input, shape index: {}]   ;;  %s3312_s2 = inlined_call_operand.vmem [shape: bf16[64,32], index: 2, kind: input, shape index: {}]   ;;  %s3313_s3 = inlined_call_operand.vmem [shape: f32[1,32], index: 3, kind: input, shape index: {}]   ;;  %s3314_s4 = inlined_call_operand.vmem [shape: bf16[3,32,32], index: 4, kind: input, shape index: {}]   ;;  %s3315_s5 = inlined_call_operand.vmem [shape: f32[3,1,32], index: 5, kind: input, shape index: {}]   ;;  %s3316_s6 = inlined_call_operand.hbm [shape: bf16[3,32,32], index: 6, kind: input, shape index: {}]   ;;  %s3317_s7 = inlined_call_operand.vmem [shape: f32[3,1,32], index: 7, kind: input, shape index: {}]   ;;  %s3318_s8 = inlined_call_operand.vmem [shape: f32[1,32], index: 8, kind: input, shape index: {}]   ;;  %s3319_s9 = inlined_call_operand.<no memory space> [shape: f32[1,1], index: 9, kind: input, shape index: {}]   ;;  %s3320_s10 = inlined_call_operand.vmem [shape: f32[8,1], index: 10, kind: output, shape index: {}]  }
   0x1   :  { %v15_v0 = vstv %s3319_s9 }
   0x2   :  { %16 = vst [vmem:[#allocation5] sm:$0x1] %v15_v0 }
   0x3   :  { %17 = vsyncpa [#allocation7], 0 }
   0x4   :  { %18 = vsyncpa [#allocation9], 0  ;;  %s2726_s15 = smov [#allocation6]   ;;  %s2678_s19 = scalar_lea.hbm %s3311_s1, 512 }
   0x5   :  { %s26_s16 = sshll.u32 %s2726_s15, 4  ;;  %p2679_p0 = scmp.ne.s32.totalorder %s3311_s1, %s2678_s19  ;;  %s27_s16 = int_to_ptr.vmem [resolvable:$true] %s26_s16 }
   0x6   :  { %p2682_p1 = scmp.lt.u32.totalorder %s2678_s19, %s3311_s1 }
   0x8   :  { %p2684_p2 = pnand %p2682_p1, %p2679_p0 }
   0xa   :  { %2687 = shalt.err (!%p2684_p2)
}
   0xb   :  { %s2688_s9 = scalar_lea.vmem %s27_s16, 512  ;;  %p2693_p4 = scmp.lt.s32.totalorder %s27_s16, %s27_s16 }
   0xc   :  { %p2689_p3 = scmp.ne.s32.totalorder %s27_s16, %s2688_s9  ;;  %p2694_p5 = scmp.lt.s32.totalorder %s2688_s9, %s2688_s9 }
   0xe   :  { %p2695_p6 = por %p2694_p5, %p2693_p4 }
  0x10   :  { %p2696_p7 = pnand %p2695_p6, %p2689_p3 }
  0x12   :  { %2699 = shalt.err (!%p2696_p7)
}
  0x13   :  { %s2727_s24 = smov 64   ;;  %s2728_s25 = smov 4  }
  0x14   :  { %32 = dma.hbm_to_vmem [thread:$0]  %s3311_s1, 512, %s27_s16, [#allocation7], %s2727_s24, %s2727_s24, %s2728_s25  }
  0x15   :  { %s2729_s28 = smov [#allocation8]   ;;  %s2700_s12 = scalar_lea.hbm %s3316_s6, 768 }
  0x16   :  { %s46_s29 = sshll.u32 %s2729_s28, 4  ;;  %p2701_p8 = scmp.ne.s32.totalorder %s3316_s6, %s2700_s12  ;;  %s47_s29 = int_to_ptr.vmem [resolvable:$true] %s46_s29 }
  0x17   :  { %p2704_p9 = scmp.lt.u32.totalorder %s2700_s12, %s3316_s6 }
  0x19   :  { %p2706_p10 = pnand %p2704_p9, %p2701_p8 }
  0x1b   :  { %2709 = shalt.err (!%p2706_p10)
}
  0x1c   :  { %s2710_s18 = scalar_lea.vmem %s47_s29, 768  ;;  %p2715_p12 = scmp.lt.s32.totalorder %s47_s29, %s47_s29 }
  0x1d   :  { %p2711_p11 = scmp.ne.s32.totalorder %s47_s29, %s2710_s18  ;;  %p2716_p13 = scmp.lt.s32.totalorder %s2710_s18, %s2710_s18 }
  0x1f   :  { %p2717_p0 = por %p2716_p13, %p2715_p12 }
  0x21   :  { %p2718_p1 = pnand %p2717_p0, %p2711_p11 }
  0x23   :  { %2721 = shalt.err (!%p2718_p1)
}
  0x24   :  { %52 = dma.hbm_to_vmem [thread:$0]  %s3316_s6, 768, %s47_s29, [#allocation9], %s2727_s24, %s2727_s24, %s2728_s25  }
  0x25   :  { %2722 = dma.done.wait [#allocation7], 512  }
  0x26   :  { %2723 = vsyncadd [#allocation7], 4294966784 }
  0x27   :  { %2724 = dma.done.wait [#allocation9], 768  }
  0x28   :  { %2725 = vsyncadd [#allocation9], 4294966528  ;;  %v2569_v1 = vld [vmem:[%s3312_s2] sm:$0xff]   ;;  %v2570_v2 = vld [vmem:[%s3312_s2 + $0x8] sm:$0xff]   ;;  %vm133_vm0 = vcmask 523264   ;;  %v2730_v14 = vmov 0.0  }
  0x29   :  { %2303 = vmatprep.subr.bf16.mxu0 %v2569_v1  ;;  %v2571_v3 = vld [vmem:[%s3312_s2 + $0x10] sm:$0xff]   ;;  %v2573_v4 = vld [vmem:[#allocation6] sm:$0xff]   ;;  %v2572_v5 = vld [vmem:[%s3312_s2 + $0x18] sm:$0xff]   ;;  %v2731_v15 = vmov 0   ;;  %vm239_vm1 = vcmask 261120   ;;  %vm2732_vm2 = vmmov 0  }
  0x2a   :  { %2304 = vmatpush3.bf16.msra.mxu0 %v2569_v1  ;;  %2311 = vmatprep.mubr.msk.bf16.mxu0 %vm133_vm0, %v2573_v4  ;;  %v2574_v6 = vld [vmem:[#allocation6 + $0x8] sm:$0xff]   ;;  %v2575_v7 = vld [vmem:[#allocation6 + $0x10] sm:$0xff]   ;;  %v2576_v8 = vld [vmem:[#allocation6 + $0x18] sm:$0xff]   ;;  %s2734_s28 = smov 1   ;;  %s2735_s29 = smov 3   ;;  %vm1949_vm11 = vcmask 56320  }
  0x2b   :  { %2305 = vmatprep.subr.bf16.mxu0 %v2570_v2  ;;  %v2577_v9 = vld [vmem:[%s3314_s4] sm:$0xff]   ;;  %v2579_v11 = vld [vmem:[%s3314_s4 + $0x8] sm:$0xff]   ;;  %v2581_v13 = vld [vmem:[%s3314_s4 + $0x10] sm:$0xff]   ;;  %2567 = vset.pattern.permute.xlu0 %v2731_v15  ;;  %s2736_s2 = smov 6   ;;  %s2737_s30 = smov 5   ;;  %vm1971_vm14 = vcmask 48128  }
  0x2c   :  { %v2578_v10 = vld [vmem:[%s3314_s4 + $0x20] sm:$0xff]   ;;  %2319 = vmatprep.subr.bf16.mxu1 %v2577_v9  ;;  %v2580_v12 = vld [vmem:[%s3314_s4 + $0x28] sm:$0xff]   ;;  %2568 = vset.pattern.permute.xlu1 %v2731_v15  ;;  %v2863_v27 = vld [vmem:[#allocation8 + $0x10] sm:$0xff]   ;;  %s2738_s11 = smov 7   ;;  %s2739_s12 = smov 126   ;;  %vm1992_vm15 = vcmask 39936  }
  0x2d   :  { %2320 = vmatpush3.bf16.msra.mxu1 %v2577_v9  ;;  %v2111_v17 = vld [vmem:[%s3313_s3] ss:$0 sm:$0xff]  ;;  %v2582_v28 = vld [vmem:[%s3314_s4 + $0x18] sm:$0xff]   ;;  %v2886_v40 = vld [vmem:[#allocation8] sm:$0xff]   ;;  %s2740_s13 = smov 127   ;;  %s2741_s14 = smov 124  }
  0x2e   :  { %2306 = vmatpush3.bf16.msra.mxu0 %v2570_v2  ;;  %2321 = vmatprep.subr.bf16.mxu1 %v2579_v11  ;;  %v2873_v32 = vld [vmem:[#allocation8 + $0x18] sm:$0xff]   ;;  %v2892_v41 = vld [vmem:[#allocation8 + $0x8] sm:$0xff]   ;;  %v2906_v42 = vld [vmem:[#allocation8 + $0x20] sm:$0xff]   ;;  %s2743_s15 = smov 122   ;;  %s2744_s17 = smov 123  }
  0x2f   :  { %2307 = vmatprep.subr.bf16.mxu0 %v2571_v3  ;;  %v2910_v43 = vld [vmem:[#allocation8 + $0x28] sm:$0xff]   ;;  %v2124_v44 = vld [vmem:[%s3315_s5] ss:$0 sm:$0xff]  ;;  %v2148_v45 = vld [vmem:[%s3315_s5 + $0x2] ss:$0 sm:$0xff]  ;;  %s2745_s18 = smov 121  }
  0x31   :  { %2322 = vmatpush3.bf16.msra.mxu1 %v2579_v11 }
  0x32   :  { %2308 = vmatpush3.bf16.msra.mxu0 %v2571_v3  ;;  %2331 = vmatprep.subr.bf16.mxu1 %v2581_v13 }
  0x33   :  { %2309 = vmatprep.subr.bf16.mxu0 %v2572_v5 }
  0x36   :  { %2310 = vmatpush3.bf16.msra.mxu0 %v2572_v5 }
  0x37   :  { %2343 = vmatprep.subr.bf16.mxu0 %v2578_v10 }
  0x39   :  { %2312 = vmatmul.mubr.msk.bf16.vlgmr.msra.gmra.mrb[0].mxu0 %vm133_vm0, %v2574_v6 }
  0x3a   :  { %2315 = vmatprep.mubr.msk.bf16.mxu0 %vm133_vm0, %v2575_v7  ;;  %2344 = vmatpush3.bf16.msra.mxu0 %v2578_v10 }
  0x3b   :  { %2345 = vmatprep.subr.bf16.mxu0 %v2580_v12 }
  0x3e   :  { %2346 = vmatpush3.bf16.msra.mxu0 %v2580_v12 }
  0x3f   :  { %2363 = vmatprep.subr.bf16.mxu0 %v2730_v14 }
  0x41   :  { %2316 = vmatmul.mubr.msk.bf16.gmra.mrb[4].mxu0 %vm133_vm0, %v2576_v8 }
 0x10c   :  { %v2313_v16 = vpop.f32.mrb[0].mxu0 }
 0x10d   :  { %v180_v18 = vpop.f32.mrb[1].mxu0  ;;  %v189_v20 = vadd.f32 %v2313_v16, %v2111_v17 }
 0x10e   :  { %v2314_v19 = vpop.f32.mrb[2].mxu0  ;;  %v181_v23 = vadd.f32 %v2111_v17, %v180_v18 }
 0x10f   :  { %v192_v21 = vadd.f32 %v2314_v19, %v2111_v17  ;;  %v183_v22 = vpop.f32.mrb[3].mxu0 }
 0x110   :  { %v184_v24 = vadd.f32 %v2111_v17, %v183_v22 }
 0x111   :  { %v212_v25 = vpack.c.bf16 %v192_v21, %v189_v20 }
 0x112   :  { %v211_v26 = vpack.c.bf16 %v184_v24, %v181_v23 }
 0x114   :  { %v2317_v29 = vpop.f32.mrb[4].mxu0  ;;  %2323 = vmatprep.mubr.msk.bf16.mxu1 %vm239_vm1, %v211_v26  ;;  %2347 = vmatprep.mubr.msk.bf16.mxu0 %vm239_vm1, %v211_v26 }
 0x115   :  { %v196_v30 = vpop.f32.mrb[5].mxu0  ;;  %2324 = vmatmul.mubr.msk.bf16.vlgmr.msra.gmra.mrb[0].mxu1 %vm239_vm1, %v212_v25  ;;  %2348 = vmatmul.mubr.msk.bf16.vlgmr.msra.gmra.mrb[8].mxu0 %vm239_vm1, %v212_v25  ;;  %v205_v33 = vadd.f32 %v2317_v29, %v2111_v17 }
 0x116   :  { %2332 = vmatpush3.bf16.msra.mxu1 %v2581_v13  ;;  %v2318_v31 = vpop.f32.mrb[6].mxu0  ;;  %2364 = vmatpush3.bf16.msra.mxu0 %v2863_v27  ;;  %v197_v36 = vadd.f32 %v2111_v17, %v196_v30 }
 0x117   :  { %v208_v34 = vadd.f32 %v2318_v31, %v2111_v17  ;;  %v199_v35 = vpop.f32.mrb[7].mxu0  ;;  %2333 = vmatprep.subr.bf16.mxu1 %v2582_v28  ;;  %2365 = vmatprep.subr.bf16.mxu0 %v2730_v14 }
 0x118   :  { %v200_v37 = vadd.f32 %v2111_v17, %v199_v35 }
 0x119   :  { %v214_v38 = vpack.c.bf16 %v208_v34, %v205_v33 }
 0x11a   :  { %v213_v39 = vpack.c.bf16 %v200_v37, %v197_v36  ;;  %2334 = vmatpush3.bf16.msra.mxu1 %v2582_v28  ;;  %2366 = vmatpush3.bf16.msra.mxu0 %v2873_v32 }
 0x11b   :  { %2355 = vmatprep.subr.bf16.mxu1 %v2730_v14  ;;  %2379 = vmatprep.subr.bf16.mxu0 %v2730_v14 }
 0x11c   :  { %2327 = vmatprep.mubr.msk.bf16.mxu1 %vm239_vm1, %v213_v39  ;;  %2351 = vmatprep.mubr.msk.bf16.mxu0 %vm239_vm1, %v213_v39 }
 0x11d   :  { %2328 = vmatmul.mubr.msk.bf16.gmra.mrb[4].mxu1 %vm239_vm1, %v214_v38  ;;  %2352 = vmatmul.mubr.msk.bf16.gmra.mrb[12].mxu0 %vm239_vm1, %v214_v38 }
 0x11e   :  { %2335 = vmatprep.mubr.msk.bf16.mxu1 %vm239_vm1, %v211_v26  ;;  %2367 = vmatprep.mubr.msk.bf16.mxu0 %vm2732_vm2, %v2730_v14 }
 0x125   :  { %2336 = vmatmul.mubr.msk.bf16.vlgmr.msra.gmra.mrb[8].mxu1 %vm239_vm1, %v212_v25  ;;  %2368 = vmatmul.mubr.bf16.vlgmr.msra.gmra.mrb[16].mxu0 %v2731_v15 }
 0x126   :  { %2356 = vmatpush3.bf16.msra.mxu1 %v2886_v40  ;;  %2339 = vmatprep.mubr.msk.bf16.mxu1 %vm239_vm1, %v213_v39  ;;  %v2965_v39 = vld [vmem:[%s3317_s7 + $0x1] ss:$0 sm:$0xff] }
 0x127   :  { %2357 = vmatprep.subr.bf16.mxu1 %v2730_v14  ;;  %2380 = vmatpush3.bf16.msra.mxu0 %v2886_v40 }
 0x128   :  { %2381 = vmatprep.subr.bf16.mxu0 %v2730_v14  ;;  %2383 = vmatprep.mubr.msk.bf16.mxu0 %vm2732_vm2, %v2730_v14 }
 0x12a   :  { %2358 = vmatpush3.bf16.msra.mxu1 %v2892_v41 }
 0x12b   :  { %2371 = vmatprep.subr.bf16.mxu1 %v2730_v14  ;;  %2382 = vmatpush3.bf16.msra.mxu0 %v2892_v41 }
 0x12c   :  { %2395 = vmatprep.subr.bf16.mxu0 %v2730_v14 }
 0x12d   :  { %2340 = vmatmul.mubr.msk.bf16.gmra.mrb[12].mxu1 %vm239_vm1, %v214_v38  ;;  %v2960_v38 = vld [vmem:[%s3317_s7] ss:$0 sm:$0xff] }
 0x12e   :  { %2359 = vmatprep.mubr.msk.bf16.mxu1 %vm2732_vm2, %v2730_v14 }
 0x135   :  { %2360 = vmatmul.mubr.bf16.vlgmr.msra.gmra.mrb[16].mxu1 %v2731_v15 }
 0x136   :  { %2372 = vmatpush3.bf16.msra.mxu1 %v2906_v42  ;;  %2375 = vmatprep.mubr.msk.bf16.mxu1 %vm2732_vm2, %v2730_v14 }
 0x137   :  { %2373 = vmatprep.subr.bf16.mxu1 %v2730_v14 }
 0x13a   :  { %2374 = vmatpush3.bf16.msra.mxu1 %v2910_v43 }
 0x13b   :  { %2387 = vmatprep.subr.bf16.mxu1 %v2730_v14 }
 0x13d   :  { %2376 = vmatmul.mubr.bf16.vlgmr.msra.gmra.mrb[20].mxu1 %v2731_v15  ;;  %v2136_v15 = vld [vmem:[%s3315_s5 + $0x1] ss:$0 sm:$0xff] }
 0x13e   :  { %2388 = vmatpush3.bf16.msra.mxu1 %v2863_v27  ;;  %2391 = vmatprep.mubr.msk.bf16.mxu1 %vm2732_vm2, %v2730_v14 }
 0x13f   :  { %2389 = vmatprep.subr.bf16.mxu1 %v2730_v14 }
 0x142   :  { %2390 = vmatpush3.bf16.msra.mxu1 %v2873_v32 }
 0x143   :  { %2403 = vmatprep.subr.bf16.mxu1 %v2730_v14 }
 0x1e8   :  { %v2325_v46 = vpop.f32.mrb[0].mxu1  ;;  %v2349_v47 = vpop.f32.mrb[8].mxu0 }
 0x1e9   :  { %v295_v48 = vadd.f32 %v2325_v46, %v2124_v44  ;;  %v493_v49 = vadd.f32 %v2349_v47, %v2148_v45  ;;  %v286_v50 = vpop.f32.mrb[1].mxu1  ;;  %v484_v51 = vpop.f32.mrb[9].mxu0 }
 0x1ea   :  { %v287_v52 = vadd.f32 %v2124_v44, %v286_v50  ;;  %v485_v53 = vadd.f32 %v2148_v45, %v484_v51  ;;  %v2326_v54 = vpop.f32.mrb[2].mxu1  ;;  %v2350_v55 = vpop.f32.mrb[10].mxu0 }
 0x1eb   :  { %320 = vst.msk [vmem:[#allocation2 + $0x10] sm:$0xff] %vm239_vm1, %v295_v48  ;;  %518 = vst.msk [vmem:[#allocation4 + $0x10] sm:$0xff] %vm239_vm1, %v493_v49  ;;  %v298_v56 = vadd.f32 %v2326_v54, %v2124_v44  ;;  %v496_v57 = vadd.f32 %v2350_v55, %v2148_v45  ;;  %v289_v58 = vpop.f32.mrb[3].mxu1  ;;  %v487_v59 = vpop.f32.mrb[11].mxu0 }
 0x1ec   :  { %318 = vst.msk [vmem:[#allocation2] sm:$0xff] %vm239_vm1, %v287_v52  ;;  %516 = vst.msk [vmem:[#allocation4] sm:$0xff] %vm239_vm1, %v485_v53  ;;  %v290_v60 = vadd.f32 %v2124_v44, %v289_v58  ;;  %v488_v61 = vadd.f32 %v2148_v45, %v487_v59 }
 0x1ed   :  { %321 = vst.msk [vmem:[#allocation2 + $0x18] sm:$0xff] %vm239_vm1, %v298_v56  ;;  %519 = vst.msk [vmem:[#allocation4 + $0x18] sm:$0xff] %vm239_vm1, %v496_v57 }
 0x1ee   :  { %319 = vst.msk [vmem:[#allocation2 + $0x8] sm:$0xff] %vm239_vm1, %v290_v60  ;;  %517 = vst.msk [vmem:[#allocation4 + $0x8] sm:$0xff] %vm239_vm1, %v488_v61 }
 0x1f0   :  { %v2329_v62 = vpop.f32.mrb[4].mxu1  ;;  %v2353_v63 = vpop.f32.mrb[12].mxu0 }
 0x1f1   :  { %v311_v0 = vadd.f32 %v2329_v62, %v2124_v44  ;;  %v509_v1 = vadd.f32 %v2353_v63, %v2148_v45  ;;  %v302_v2 = vpop.f32.mrb[5].mxu1  ;;  %v500_v3 = vpop.f32.mrb[13].mxu0  ;;  %v2972_v63 = vld [vmem:[%s3317_s7 + $0x2] ss:$0 sm:$0xff] }
 0x1f2   :  { %v303_v4 = vadd.f32 %v2124_v44, %v302_v2  ;;  %v501_v5 = vadd.f32 %v2148_v45, %v500_v3  ;;  %v2330_v6 = vpop.f32.mrb[6].mxu1  ;;  %v2354_v7 = vpop.f32.mrb[14].mxu0 }
 0x1f3   :  { %324 = vst.msk [vmem:[#allocation2 + $0x30] sm:$0xff] %vm239_vm1, %v311_v0  ;;  %522 = vst.msk [vmem:[#allocation4 + $0x30] sm:$0xff] %vm239_vm1, %v509_v1  ;;  %v314_v8 = vadd.f32 %v2330_v6, %v2124_v44  ;;  %v512_v9 = vadd.f32 %v2354_v7, %v2148_v45  ;;  %v305_v10 = vpop.f32.mrb[7].mxu1  ;;  %v503_v11 = vpop.f32.mrb[15].mxu0  ;;  %v551_v48 = vld [vmem:[#allocation2] sm:$0xff] }
 0x1f4   :  { %322 = vst.msk [vmem:[#allocation2 + $0x20] sm:$0xff] %vm239_vm1, %v303_v4  ;;  %520 = vst.msk [vmem:[#allocation4 + $0x20] sm:$0xff] %vm239_vm1, %v501_v5  ;;  %v306_v12 = vadd.f32 %v2124_v44, %v305_v10  ;;  %v504_v13 = vadd.f32 %v2148_v45, %v503_v11  ;;  %v553_v4 = vld [vmem:[#allocation4] sm:$0xff] }
 0x1f5   :  { %325 = vst.msk [vmem:[#allocation2 + $0x38] sm:$0xff] %vm239_vm1, %v314_v8  ;;  %523 = vst.msk [vmem:[#allocation4 + $0x38] sm:$0xff] %vm239_vm1, %v512_v9  ;;  %v2978_v11 = vld [vmem:[%s3318_s8] ss:$0 sm:$0xff] }
 0x1f6   :  { %323 = vst.msk [vmem:[#allocation2 + $0x28] sm:$0xff] %vm239_vm1, %v306_v12  ;;  %521 = vst.msk [vmem:[#allocation4 + $0x28] sm:$0xff] %vm239_vm1, %v504_v13 }
 0x1f8   :  { %v2337_v16 = vpop.f32.mrb[8].mxu1  ;;  %v667_v17 = vpop.f32.mrb[16].mxu0 }
 0x1f9   :  { %v394_v18 = vadd.f32 %v2337_v16, %v2136_v15  ;;  %v385_v19 = vpop.f32.mrb[9].mxu1  ;;  %v2369_v20 = vpop.f32.mrb[17].mxu0  ;;  %v668_v47 = vadd.f32 %v2965_v39, %v667_v17  ;;  %v3008_v17 = vld [vmem:[#allocation5] ss:$0 sm:$0xff] }
 0x1fa   :  { %v386_v21 = vadd.f32 %v2136_v15, %v385_v19  ;;  %v2338_v22 = vpop.f32.mrb[10].mxu1  ;;  %v670_v23 = vpop.f32.mrb[18].mxu0 }
 0x1fb   :  { %419 = vst.msk [vmem:[#allocation3 + $0x10] sm:$0xff] %vm239_vm1, %v394_v18  ;;  %v397_v24 = vadd.f32 %v2338_v22, %v2136_v15  ;;  %v388_v25 = vpop.f32.mrb[11].mxu1  ;;  %v2370_v26 = vpop.f32.mrb[19].mxu0 }
 0x1fc   :  { %417 = vst.msk [vmem:[#allocation3] sm:$0xff] %vm239_vm1, %v386_v21  ;;  %v389_v28 = vadd.f32 %v2136_v15, %v388_v25  ;;  %v778_v25 = vld [vmem:[#allocation2 + $0x8] sm:$0xff] }
 0x1fd   :  { %420 = vst.msk [vmem:[#allocation3 + $0x18] sm:$0xff] %vm239_vm1, %v397_v24 }
 0x1fe   :  { %418 = vst.msk [vmem:[#allocation3 + $0x8] sm:$0xff] %vm239_vm1, %v389_v28 }
 0x200   :  { %v2341_v29 = vpop.f32.mrb[12].mxu1 }
 0x201   :  { %v410_v30 = vadd.f32 %v2341_v29, %v2136_v15  ;;  %v401_v31 = vpop.f32.mrb[13].mxu1 }
 0x202   :  { %v402_v33 = vadd.f32 %v2136_v15, %v401_v31  ;;  %v2342_v34 = vpop.f32.mrb[14].mxu1 }
 0x203   :  { %423 = vst.msk [vmem:[#allocation3 + $0x30] sm:$0xff] %vm239_vm1, %v410_v30  ;;  %v413_v35 = vadd.f32 %v2342_v34, %v2136_v15  ;;  %v404_v36 = vpop.f32.mrb[15].mxu1  ;;  %v552_v50 = vld [vmem:[#allocation3] sm:$0xff] }
 0x204   :  { %421 = vst.msk [vmem:[#allocation3 + $0x20] sm:$0xff] %vm239_vm1, %v402_v33  ;;  %v405_v37 = vadd.f32 %v2136_v15, %v404_v36  ;;  %v738_v54 = vadd.f32 %v668_v47, %v552_v50 }
 0x205   :  { %424 = vst.msk [vmem:[#allocation3 + $0x38] sm:$0xff] %vm239_vm1, %v413_v35  ;;  %v780_v35 = vld [vmem:[#allocation3 + $0x8] sm:$0xff] }
 0x206   :  { %422 = vst.msk [vmem:[#allocation3 + $0x28] sm:$0xff] %vm239_vm1, %v405_v37  ;;  %v2167_v57 = vmul.f32 -1.442695, %v738_v54 }
 0x208   :  { %v609_v44 = vpop.f32.mrb[16].mxu1 }
 0x209   :  { %v610_v45 = vadd.f32 %v2960_v38, %v609_v44  ;;  %v2361_v46 = vpop.f32.mrb[17].mxu1 }
 0x20a   :  { %v612_v49 = vpop.f32.mrb[18].mxu1 }
 0x20b   :  { %v731_v51 = vadd.f32 %v610_v45, %v551_v48  ;;  %v2362_v52 = vpop.f32.mrb[19].mxu1 }
 0x20d   :  { %v2166_v53 = vmul.f32 -1.442695, %v731_v51 }
 0x20f   :  { %2589 = vpow2.f32 %v2166_v53 }
 0x210   :  { %v725_v55 = vpop.f32.mrb[20].mxu1  ;;  %2591 = vpow2.f32 %v2167_v57 }
 0x211   :  { %v2377_v56 = vpop.f32.mrb[21].mxu1  ;;  %v726_v1 = vadd.f32 %v2972_v63, %v725_v55  ;;  %v782_v55 = vld [vmem:[#allocation4 + $0x8] sm:$0xff] }
 0x212   :  { %v728_v58 = vpop.f32.mrb[22].mxu1 }
 0x213   :  { %v2378_v59 = vpop.f32.mrb[23].mxu1 }
 0x219   :  { %v2590_v60 = vpop.eup %2589 }
 0x21a   :  { %v735_v61 = vadd.f32 1.0, %v2590_v60  ;;  %v2592_v62 = vpop.eup %2591 }
 0x21b   :  { %v742_v0 = vadd.f32 1.0, %v2592_v62 }
 0x21c   :  { %2593 = vrcp.f32 %v735_v61 }
 0x21d   :  { %2595 = vrcp.f32 %v742_v0 }
 0x226   :  { %v2594_v2 = vpop.eup %2593 }
 0x227   :  { %v745_v3 = vmul.f32 %v2594_v2, %v726_v1  ;;  %v2596_v6 = vpop.eup %2595 }
 0x228   :  { %v748_v7 = vsub.f32 1.0, %v2596_v6  ;;  %v750_v9 = vmul.f32 0.0, %v2596_v6 }
 0x229   :  { %v746_v5 = vadd.f32 %v745_v3, %v553_v4 }
 0x22b   :  { %2597 = vtanh.f32 %v746_v5 }
 0x235   :  { %v2598_v8 = vpop.eup %2597 }
 0x236   :  { %v749_v10 = vmul.f32 %v2598_v8, %v748_v7  ;;  %v942_v8 = vld [vmem:[#allocation2 + $0x10] sm:$0xff] }
 0x238   :  { %v2980_v12 = vadd.f32 %v750_v9, %v749_v10 }
 0x23a   :  { %v783_v13 = vpack.c.bf16 %v2980_v12, %v2980_v12  ;;  %v758_v15 = vmul.f32 %v2978_v11, %v2980_v12 }
 0x23c   :  { %2384 = vmatmul.mubr.msk.bf16.vlgmr.msra.gmra.mrb[20].mxu0 %vm239_vm1, %v783_v13  ;;  %2392 = vmatmul.mubr.msk.bf16.vlgmr.msra.gmra.mrb[24].mxu1 %vm239_vm1, %v783_v13  ;;  %v759_v16 = vsel %vm239_vm1, %v758_v15, 0.0 }
 0x23d   :  { %2396 = vmatpush3.bf16.msra.mxu0 %v2906_v42  ;;  %760 = vadd.xlane.f32.xlu0 %v759_v16 }
 0x23e   :  { %2397 = vmatprep.subr.bf16.mxu0 %v2730_v14  ;;  %2399 = vmatprep.mubr.msk.bf16.mxu0 %vm2732_vm2, %v2730_v14 }
 0x23f   :  { %2404 = vmatpush3.bf16.msra.mxu1 %v2886_v40  ;;  %2407 = vmatprep.mubr.msk.bf16.mxu1 %vm2732_vm2, %v2730_v14 }
 0x240   :  { %2405 = vmatprep.subr.bf16.mxu1 %v2730_v14 }
 0x241   :  { %2398 = vmatpush3.bf16.msra.mxu0 %v2910_v43 }
 0x242   :  { %2411 = vmatprep.subr.bf16.mxu0 %v2730_v14 }
 0x243   :  { %2406 = vmatpush3.bf16.msra.mxu1 %v2892_v41 }
 0x244   :  { %2400 = vmatmul.mubr.msk.bf16.vlgmr.msra.gmra.mrb[24].mxu0 %vm239_vm1, %v783_v13  ;;  %2419 = vmatprep.subr.bf16.mxu1 %v2730_v14 }
 0x245   :  { %2412 = vmatpush3.bf16.msra.mxu0 %v2863_v27  ;;  %2415 = vmatprep.mubr.msk.bf16.mxu0 %vm2732_vm2, %v2730_v14 }
 0x246   :  { %2413 = vmatprep.subr.bf16.mxu0 %v2730_v14 }
 0x249   :  { %2414 = vmatpush3.bf16.msra.mxu0 %v2873_v32 }
 0x24a   :  { %2427 = vmatprep.subr.bf16.mxu0 %v2730_v14 }
 0x2ca   :  { %v761_v18 = vpop.xlane.xlu0 %760 }
 0x2cb   :  { %v768_v19 = vadd.f32 %v3008_v17, %v761_v18 }
 0x2cd   :  { %772 = vperm.xlu0 %2567, %v768_v19   ;;  %v944_v19 = vld [vmem:[#allocation3 + $0x10] sm:$0xff] }
 0x30f   :  { %v821_v20 = vpop.f32.mrb[20].mxu0  ;;  %v861_v21 = vpop.f32.mrb[24].mxu1 }
 0x310   :  { %v822_v22 = vadd.f32 %v2960_v38, %v821_v20  ;;  %v2385_v23 = vpop.f32.mrb[21].mxu0  ;;  %v2393_v24 = vpop.f32.mrb[25].mxu1  ;;  %v862_v26 = vadd.f32 %v2965_v39, %v861_v21 }
 0x311   :  { %v824_v28 = vpop.f32.mrb[22].mxu0  ;;  %v864_v29 = vpop.f32.mrb[26].mxu1 }
 0x312   :  { %v907_v30 = vadd.f32 %v822_v22, %v778_v25  ;;  %v2386_v31 = vpop.f32.mrb[23].mxu0  ;;  %v2394_v33 = vpop.f32.mrb[27].mxu1  ;;  %v914_v36 = vadd.f32 %v862_v26, %v780_v35  ;;  %v946_v35 = vld [vmem:[#allocation4 + $0x10] sm:$0xff] }
 0x314   :  { %v2173_v34 = vmul.f32 -1.442695, %v907_v30  ;;  %v2174_v45 = vmul.f32 -1.442695, %v914_v36 }
 0x316   :  { %2599 = vpow2.f32 %v2173_v34 }
 0x317   :  { %v901_v37 = vpop.f32.mrb[24].mxu0  ;;  %2601 = vpow2.f32 %v2174_v45 }
 0x318   :  { %v2401_v44 = vpop.f32.mrb[25].mxu0  ;;  %v902_v52 = vadd.f32 %v2972_v63, %v901_v37 }
 0x319   :  { %v904_v46 = vpop.f32.mrb[26].mxu0 }
 0x31a   :  { %v2402_v47 = vpop.f32.mrb[27].mxu0 }
 0x320   :  { %v2600_v48 = vpop.eup %2599 }
 0x321   :  { %v911_v49 = vadd.f32 1.0, %v2600_v48  ;;  %v2602_v50 = vpop.eup %2601 }
 0x322   :  { %v918_v51 = vadd.f32 1.0, %v2602_v50 }
 0x323   :  { %2603 = vrcp.f32 %v911_v49 }
 0x324   :  { %2605 = vrcp.f32 %v918_v51 }
 0x32d   :  { %v2604_v53 = vpop.eup %2603 }
 0x32e   :  { %v921_v54 = vmul.f32 %v2604_v53, %v902_v52  ;;  %v2606_v57 = vpop.eup %2605 }
 0x32f   :  { %v924_v58 = vsub.f32 1.0, %v2606_v57  ;;  %v926_v60 = vmul.f32 %v2606_v57, %v2980_v12  ;;  %v1106_v57 = vld [vmem:[#allocation2 + $0x18] sm:$0xff] }
 0x330   :  { %v922_v56 = vadd.f32 %v921_v54, %v782_v55 }
 0x332   :  { %2607 = vtanh.f32 %v922_v56 }
 0x33c   :  { %v2608_v59 = vpop.eup %2607 }
 0x33d   :  { %v925_v61 = vmul.f32 %v2608_v59, %v924_v58 }
 0x33f   :  { %v927_v62 = vadd.f32 %v926_v60, %v925_v61 }
 0x341   :  { %v947_v0 = vpack.c.bf16 %v927_v62, %v927_v62  ;;  %v928_v1 = vmul.f32 %v2978_v11, %v927_v62 }
 0x343   :  { %2408 = vmatmul.mubr.msk.bf16.vlgmr.msra.gmra.mrb[28].mxu1 %vm239_vm1, %v947_v0  ;;  %2416 = vmatmul.mubr.msk.bf16.vlgmr.msra.gmra.mrb[28].mxu0 %vm239_vm1, %v947_v0  ;;  %v929_v2 = vsel %vm239_vm1, %v928_v1, 0.0 }
 0x344   :  { %2420 = vmatpush3.bf16.msra.mxu1 %v2906_v42  ;;  %930 = vadd.xlane.f32.xlu1 %v929_v2  ;;  %v1108_v2 = vld [vmem:[#allocation3 + $0x18] sm:$0xff] }
 0x345   :  { %2421 = vmatprep.subr.bf16.mxu1 %v2730_v14  ;;  %2423 = vmatprep.mubr.msk.bf16.mxu1 %vm2732_vm2, %v2730_v14 }
 0x346   :  { %2428 = vmatpush3.bf16.msra.mxu0 %v2886_v40  ;;  %2431 = vmatprep.mubr.msk.bf16.mxu0 %vm2732_vm2, %v2730_v14 }
 0x347   :  { %2429 = vmatprep.subr.bf16.mxu0 %v2730_v14 }
 0x348   :  { %2422 = vmatpush3.bf16.msra.mxu1 %v2910_v43 }
 0x349   :  { %2435 = vmatprep.subr.bf16.mxu1 %v2730_v14 }
 0x34a   :  { %2430 = vmatpush3.bf16.msra.mxu0 %v2892_v41 }
 0x34b   :  { %2424 = vmatmul.mubr.msk.bf16.vlgmr.msra.gmra.mrb[32].mxu1 %vm239_vm1, %v947_v0  ;;  %2443 = vmatprep.subr.bf16.mxu0 %v2730_v14 }
 0x34c   :  { %2436 = vmatpush3.bf16.msra.mxu1 %v2863_v27  ;;  %2439 = vmatprep.mubr.msk.bf16.mxu1 %vm2732_vm2, %v2730_v14 }
 0x34d   :  { %2437 = vmatprep.subr.bf16.mxu1 %v2730_v14 }
 0x350   :  { %2438 = vmatpush3.bf16.msra.mxu1 %v2873_v32 }
 0x351   :  { %2451 = vmatprep.subr.bf16.mxu1 %v2730_v14 }
 0x416   :  { %v985_v3 = vpop.f32.mrb[28].mxu1  ;;  %v1025_v4 = vpop.f32.mrb[28].mxu0 }
 0x417   :  { %v986_v5 = vadd.f32 %v2960_v38, %v985_v3  ;;  %v2409_v6 = vpop.f32.mrb[29].mxu1  ;;  %v2417_v7 = vpop.f32.mrb[29].mxu0  ;;  %v1026_v9 = vadd.f32 %v2965_v39, %v1025_v4 }
 0x418   :  { %v988_v10 = vpop.f32.mrb[30].mxu1  ;;  %v1028_v12 = vpop.f32.mrb[30].mxu0 }
 0x419   :  { %v1071_v13 = vadd.f32 %v986_v5, %v942_v8  ;;  %v2410_v15 = vpop.f32.mrb[31].mxu1  ;;  %v2418_v16 = vpop.f32.mrb[31].mxu0  ;;  %v1078_v20 = vadd.f32 %v1026_v9, %v944_v19  ;;  %v1110_v19 = vld [vmem:[#allocation4 + $0x18] sm:$0xff] }
 0x41b   :  { %v2178_v18 = vmul.f32 -1.442695, %v1071_v13  ;;  %v2179_v23 = vmul.f32 -1.442695, %v1078_v20 }
 0x41d   :  { %2609 = vpow2.f32 %v2178_v18 }
 0x41e   :  { %v1065_v21 = vpop.f32.mrb[32].mxu1  ;;  %2611 = vpow2.f32 %v2179_v23 }
 0x41f   :  { %v2425_v22 = vpop.f32.mrb[33].mxu1  ;;  %v1066_v31 = vadd.f32 %v2972_v63, %v1065_v21 }
 0x420   :  { %v1068_v24 = vpop.f32.mrb[34].mxu1 }
 0x421   :  { %v2426_v25 = vpop.f32.mrb[35].mxu1 }
 0x427   :  { %v2610_v26 = vpop.eup %2609 }
 0x428   :  { %v1075_v28 = vadd.f32 1.0, %v2610_v26  ;;  %v2612_v29 = vpop.eup %2611 }
 0x429   :  { %v1082_v30 = vadd.f32 1.0, %v2612_v29 }
 0x42a   :  { %2613 = vrcp.f32 %v1075_v28 }
 0x42b   :  { %2615 = vrcp.f32 %v1082_v30 }
 0x434   :  { %v2614_v33 = vpop.eup %2613 }
 0x435   :  { %v1085_v34 = vmul.f32 %v2614_v33, %v1066_v31  ;;  %v2616_v37 = vpop.eup %2615  ;;  %v3095_v31 = vpop.xlane.xlu1 %930 }
 0x436   :  { %v1088_v44 = vsub.f32 1.0, %v2616_v37  ;;  %v1090_v46 = vmul.f32 %v2616_v37, %v927_v62 }
 0x437   :  { %v1086_v36 = vadd.f32 %v1085_v34, %v946_v35 }
 0x439   :  { %2617 = vtanh.f32 %v1086_v36 }
 0x443   :  { %v2618_v45 = vpop.eup %2617 }
 0x444   :  { %v1089_v47 = vmul.f32 %v2618_v45, %v1088_v44 }
 0x446   :  { %v1091_v48 = vadd.f32 %v1090_v46, %v1089_v47  ;;  %v1270_v47 = vld [vmem:[#allocation2 + $0x20] sm:$0xff] }
 0x448   :  { %v1111_v49 = vpack.c.bf16 %v1091_v48, %v1091_v48  ;;  %v1092_v50 = vmul.f32 %v2978_v11, %v1091_v48 }
 0x44a   :  { %2432 = vmatmul.mubr.msk.bf16.vlgmr.msra.gmra.mrb[32].mxu0 %vm239_vm1, %v1111_v49  ;;  %2440 = vmatmul.mubr.msk.bf16.vlgmr.msra.gmra.mrb[36].mxu1 %vm239_vm1, %v1111_v49  ;;  %v1093_v51 = vsel %vm239_vm1, %v1092_v50, 0.0 }
 0x44b   :  { %2444 = vmatpush3.bf16.msra.mxu0 %v2906_v42  ;;  %1094 = vadd.xlane.f32.xlu1 %v1093_v51 }
 0x44c   :  { %2445 = vmatprep.subr.bf16.mxu0 %v2730_v14  ;;  %2447 = vmatprep.mubr.msk.bf16.mxu0 %vm2732_vm2, %v2730_v14 }
 0x44d   :  { %2452 = vmatpush3.bf16.msra.mxu1 %v2886_v40  ;;  %2455 = vmatprep.mubr.msk.bf16.mxu1 %vm2732_vm2, %v2730_v14 }
 0x44e   :  { %2453 = vmatprep.subr.bf16.mxu1 %v2730_v14 }
 0x44f   :  { %2446 = vmatpush3.bf16.msra.mxu0 %v2910_v43 }
 0x450   :  { %2459 = vmatprep.subr.bf16.mxu0 %v2730_v14 }
 0x451   :  { %2454 = vmatpush3.bf16.msra.mxu1 %v2892_v41 }
 0x452   :  { %2448 = vmatmul.mubr.msk.bf16.vlgmr.msra.gmra.mrb[36].mxu0 %vm239_vm1, %v1111_v49  ;;  %2467 = vmatprep.subr.bf16.mxu1 %v2730_v14 }
 0x453   :  { %2460 = vmatpush3.bf16.msra.mxu0 %v2863_v27  ;;  %2463 = vmatprep.mubr.msk.bf16.mxu0 %vm2732_vm2, %v2730_v14 }
 0x454   :  { %2461 = vmatprep.subr.bf16.mxu0 %v2730_v14 }
 0x457   :  { %2462 = vmatpush3.bf16.msra.mxu0 %v2873_v32 }
 0x458   :  { %2475 = vmatprep.subr.bf16.mxu0 %v2730_v14 }
 0x4d8   :  { %v3097_v33 = vpop.xlane.xlu1 %1094 }
 0x51d   :  { %v1149_v52 = vpop.f32.mrb[32].mxu0  ;;  %v1189_v53 = vpop.f32.mrb[36].mxu1 }
 0x51e   :  { %v1150_v54 = vadd.f32 %v2960_v38, %v1149_v52  ;;  %v2433_v55 = vpop.f32.mrb[33].mxu0  ;;  %v2441_v56 = vpop.f32.mrb[37].mxu1  ;;  %v1190_v58 = vadd.f32 %v2965_v39, %v1189_v53 }
 0x51f   :  { %v1152_v59 = vpop.f32.mrb[34].mxu0  ;;  %v1192_v60 = vpop.f32.mrb[38].mxu1  ;;  %v1272_v55 = vld [vmem:[#allocation3 + $0x20] sm:$0xff] }
 0x520   :  { %v1235_v61 = vadd.f32 %v1150_v54, %v1106_v57  ;;  %v2434_v62 = vpop.f32.mrb[35].mxu0  ;;  %v2442_v0 = vpop.f32.mrb[39].mxu1  ;;  %v1242_v3 = vadd.f32 %v1190_v58, %v1108_v2 }
 0x522   :  { %v2183_v1 = vmul.f32 -1.442695, %v1235_v61  ;;  %v2184_v6 = vmul.f32 -1.442695, %v1242_v3 }
 0x524   :  { %2619 = vpow2.f32 %v2183_v1 }
 0x525   :  { %v1229_v4 = vpop.f32.mrb[36].mxu0  ;;  %2621 = vpow2.f32 %v2184_v6  ;;  %v1274_v6 = vld [vmem:[#allocation4 + $0x20] sm:$0xff] }
 0x526   :  { %v2449_v5 = vpop.f32.mrb[37].mxu0  ;;  %v1230_v15 = vadd.f32 %v2972_v63, %v1229_v4 }
 0x527   :  { %v1232_v7 = vpop.f32.mrb[38].mxu0 }
 0x528   :  { %v2450_v8 = vpop.f32.mrb[39].mxu0 }
 0x52e   :  { %v2620_v9 = vpop.eup %2619 }
 0x52f   :  { %v1239_v10 = vadd.f32 1.0, %v2620_v9  ;;  %v2622_v12 = vpop.eup %2621 }
 0x530   :  { %v1246_v13 = vadd.f32 1.0, %v2622_v12 }
 0x531   :  { %2623 = vrcp.f32 %v1239_v10 }
 0x532   :  { %2625 = vrcp.f32 %v1246_v13 }
 0x53b   :  { %v2624_v16 = vpop.eup %2623 }
 0x53c   :  { %v1249_v18 = vmul.f32 %v2624_v16, %v1230_v15  ;;  %v2626_v21 = vpop.eup %2625 }
 0x53d   :  { %v1252_v22 = vsub.f32 1.0, %v2626_v21  ;;  %v1254_v24 = vmul.f32 %v2626_v21, %v1091_v48 }
 0x53e   :  { %v1250_v20 = vadd.f32 %v1249_v18, %v1110_v19 }
 0x540   :  { %2627 = vtanh.f32 %v1250_v20 }
 0x54a   :  { %v2628_v23 = vpop.eup %2627 }
 0x54b   :  { %v1253_v25 = vmul.f32 %v2628_v23, %v1252_v22 }
 0x54d   :  { %v3067_v26 = vadd.f32 %v1254_v24, %v1253_v25  ;;  %v1434_v25 = vld [vmem:[#allocation2 + $0x28] sm:$0xff] }
 0x54f   :  { %v1275_v28 = vpack.c.bf16 %v3067_v26, %v3067_v26  ;;  %v1256_v29 = vmul.f32 %v2978_v11, %v3067_v26 }
 0x551   :  { %2456 = vmatmul.mubr.msk.bf16.vlgmr.msra.gmra.mrb[40].mxu1 %vm239_vm1, %v1275_v28  ;;  %2464 = vmatmul.mubr.msk.bf16.vlgmr.msra.gmra.mrb[40].mxu0 %vm239_vm1, %v1275_v28  ;;  %v1257_v30 = vsel %vm239_vm1, %v1256_v29, 0.0 }
 0x552   :  { %2468 = vmatpush3.bf16.msra.mxu1 %v2906_v42  ;;  %1258 = vadd.xlane.f32.xlu1 %v1257_v30 }
 0x553   :  { %2469 = vmatprep.subr.bf16.mxu1 %v2730_v14  ;;  %2471 = vmatprep.mubr.msk.bf16.mxu1 %vm2732_vm2, %v2730_v14 }
 0x554   :  { %2476 = vmatpush3.bf16.msra.mxu0 %v2886_v40  ;;  %2479 = vmatprep.mubr.msk.bf16.mxu0 %vm2732_vm2, %v2730_v14 }
 0x555   :  { %2477 = vmatprep.subr.bf16.mxu0 %v2730_v14 }
 0x556   :  { %2470 = vmatpush3.bf16.msra.mxu1 %v2910_v43 }
 0x557   :  { %2483 = vmatprep.subr.bf16.mxu1 %v2730_v14 }
 0x558   :  { %2478 = vmatpush3.bf16.msra.mxu0 %v2892_v41 }
 0x559   :  { %2472 = vmatmul.mubr.msk.bf16.vlgmr.msra.gmra.mrb[44].mxu1 %vm239_vm1, %v1275_v28  ;;  %2491 = vmatprep.subr.bf16.mxu0 %v2730_v14 }
 0x55a   :  { %2484 = vmatpush3.bf16.msra.mxu1 %v2863_v27  ;;  %2487 = vmatprep.mubr.msk.bf16.mxu1 %vm2732_vm2, %v2730_v14 }
 0x55b   :  { %2485 = vmatprep.subr.bf16.mxu1 %v2730_v14 }
 0x55e   :  { %2486 = vmatpush3.bf16.msra.mxu1 %v2873_v32 }
 0x55f   :  { %2499 = vmatprep.subr.bf16.mxu1 %v2730_v14 }
 0x5df   :  { %v1259_v34 = vpop.xlane.xlu1 %1258 }
 0x5e0   :  { %v1260_v35 = vadd.f32 %v3008_v17, %v1259_v34 }
 0x5e2   :  { %1264 = vperm.xlu0 %2567, %v1260_v35  }
 0x624   :  { %v1313_v36 = vpop.f32.mrb[40].mxu1  ;;  %v1353_v37 = vpop.f32.mrb[40].mxu0 }
 0x625   :  { %v1314_v44 = vadd.f32 %v2960_v38, %v1313_v36  ;;  %v2457_v45 = vpop.f32.mrb[41].mxu1  ;;  %v2465_v46 = vpop.f32.mrb[41].mxu0  ;;  %v1354_v48 = vadd.f32 %v2965_v39, %v1353_v37  ;;  %v1436_v36 = vld [vmem:[#allocation3 + $0x28] sm:$0xff] }
 0x626   :  { %v1316_v49 = vpop.f32.mrb[42].mxu1  ;;  %v1356_v50 = vpop.f32.mrb[42].mxu0 }
 0x627   :  { %v1399_v51 = vadd.f32 %v1314_v44, %v1270_v47  ;;  %v2458_v52 = vpop.f32.mrb[43].mxu1  ;;  %v2466_v53 = vpop.f32.mrb[43].mxu0  ;;  %v1406_v56 = vadd.f32 %v1354_v48, %v1272_v55 }
 0x629   :  { %v2188_v54 = vmul.f32 -1.442695, %v1399_v51  ;;  %v2189_v59 = vmul.f32 -1.442695, %v1406_v56  ;;  %v1438_v56 = vld [vmem:[#allocation4 + $0x28] sm:$0xff] }
 0x62b   :  { %2629 = vpow2.f32 %v2188_v54 }
 0x62c   :  { %v1393_v57 = vpop.f32.mrb[44].mxu1  ;;  %2631 = vpow2.f32 %v2189_v59 }
 0x62d   :  { %v2473_v58 = vpop.f32.mrb[45].mxu1  ;;  %v1394_v3 = vadd.f32 %v2972_v63, %v1393_v57 }
 0x62e   :  { %v1396_v60 = vpop.f32.mrb[46].mxu1 }
 0x62f   :  { %v2474_v61 = vpop.f32.mrb[47].mxu1 }
 0x635   :  { %v2630_v62 = vpop.eup %2629 }
 0x636   :  { %v1403_v0 = vadd.f32 1.0, %v2630_v62  ;;  %v2632_v1 = vpop.eup %2631 }
 0x637   :  { %v1410_v2 = vadd.f32 1.0, %v2632_v1 }
 0x638   :  { %2633 = vrcp.f32 %v1403_v0 }
 0x639   :  { %2635 = vrcp.f32 %v1410_v2 }
 0x642   :  { %v2634_v4 = vpop.eup %2633 }
 0x643   :  { %v1413_v5 = vmul.f32 %v2634_v4, %v1394_v3  ;;  %v2636_v8 = vpop.eup %2635 }
 0x644   :  { %v1416_v9 = vsub.f32 1.0, %v2636_v8  ;;  %v1418_v12 = vmul.f32 %v2636_v8, %v3067_v26 }
 0x645   :  { %v1414_v7 = vadd.f32 %v1413_v5, %v1274_v6 }
 0x647   :  { %2637 = vtanh.f32 %v1414_v7 }
 0x651   :  { %v2638_v10 = vpop.eup %2637 }
 0x652   :  { %v1417_v13 = vmul.f32 %v2638_v10, %v1416_v9  ;;  %v1598_v9 = vld [vmem:[#allocation2 + $0x30] sm:$0xff] }
 0x654   :  { %v1419_v15 = vadd.f32 %v1418_v12, %v1417_v13 }
 0x656   :  { %v1439_v16 = vpack.c.bf16 %v1419_v15, %v1419_v15  ;;  %v1420_v18 = vmul.f32 %v2978_v11, %v1419_v15 }
 0x658   :  { %2480 = vmatmul.mubr.msk.bf16.vlgmr.msra.gmra.mrb[44].mxu0 %vm239_vm1, %v1439_v16  ;;  %2488 = vmatmul.mubr.msk.bf16.vlgmr.msra.gmra.mrb[48].mxu1 %vm239_vm1, %v1439_v16  ;;  %v1421_v19 = vsel %vm239_vm1, %v1420_v18, 0.0 }
 0x659   :  { %2492 = vmatpush3.bf16.msra.mxu0 %v2906_v42  ;;  %1422 = vadd.xlane.f32.xlu1 %v1421_v19  ;;  %v1600_v19 = vld [vmem:[#allocation3 + $0x30] sm:$0xff] }
 0x65a   :  { %2493 = vmatprep.subr.bf16.mxu0 %v2730_v14  ;;  %2495 = vmatprep.mubr.msk.bf16.mxu0 %vm2732_vm2, %v2730_v14 }
 0x65b   :  { %2500 = vmatpush3.bf16.msra.mxu1 %v2886_v40  ;;  %2503 = vmatprep.mubr.msk.bf16.mxu1 %vm2732_vm2, %v2730_v14 }
 0x65c   :  { %2501 = vmatprep.subr.bf16.mxu1 %v2730_v14 }
 0x65d   :  { %2494 = vmatpush3.bf16.msra.mxu0 %v2910_v43 }
 0x65e   :  { %2507 = vmatprep.subr.bf16.mxu0 %v2730_v14 }
 0x65f   :  { %2502 = vmatpush3.bf16.msra.mxu1 %v2892_v41 }
 0x660   :  { %2496 = vmatmul.mubr.msk.bf16.vlgmr.msra.gmra.mrb[48].mxu0 %vm239_vm1, %v1439_v16  ;;  %2515 = vmatprep.subr.bf16.mxu1 %v2730_v14 }
 0x661   :  { %2508 = vmatpush3.bf16.msra.mxu0 %v2863_v27  ;;  %2511 = vmatprep.mubr.msk.bf16.mxu0 %vm2732_vm2, %v2730_v14 }
 0x662   :  { %2509 = vmatprep.subr.bf16.mxu0 %v2730_v14 }
 0x665   :  { %2510 = vmatpush3.bf16.msra.mxu0 %v2873_v32 }
 0x666   :  { %2523 = vmatprep.subr.bf16.mxu0 %v2730_v14 }
 0x72b   :  { %v1477_v20 = vpop.f32.mrb[44].mxu0  ;;  %v1517_v21 = vpop.f32.mrb[48].mxu1 }
 0x72c   :  { %v1478_v22 = vadd.f32 %v2960_v38, %v1477_v20  ;;  %v2481_v23 = vpop.f32.mrb[45].mxu0  ;;  %v2489_v24 = vpop.f32.mrb[49].mxu1  ;;  %v1518_v26 = vadd.f32 %v2965_v39, %v1517_v21 }
 0x72d   :  { %v1480_v28 = vpop.f32.mrb[46].mxu0  ;;  %v1520_v27 = vpop.f32.mrb[50].mxu1 }
 0x72e   :  { %v1563_v29 = vadd.f32 %v1478_v22, %v1434_v25  ;;  %v2482_v30 = vpop.f32.mrb[47].mxu0  ;;  %v2490_v34 = vpop.f32.mrb[51].mxu1  ;;  %v1570_v37 = vadd.f32 %v1518_v26, %v1436_v36  ;;  %v1602_v36 = vld [vmem:[#allocation4 + $0x30] sm:$0xff] }
 0x730   :  { %v2193_v35 = vmul.f32 -1.442695, %v1563_v29  ;;  %v2194_v46 = vmul.f32 -1.442695, %v1570_v37 }
 0x732   :  { %2639 = vpow2.f32 %v2193_v35 }
 0x733   :  { %v1557_v44 = vpop.f32.mrb[48].mxu0  ;;  %2641 = vpow2.f32 %v2194_v46 }
 0x734   :  { %v2497_v45 = vpop.f32.mrb[49].mxu0  ;;  %v1558_v53 = vadd.f32 %v2972_v63, %v1557_v44 }
 0x735   :  { %v1560_v47 = vpop.f32.mrb[50].mxu0 }
 0x736   :  { %v2498_v48 = vpop.f32.mrb[51].mxu0 }
 0x73c   :  { %v2640_v49 = vpop.eup %2639 }
 0x73d   :  { %v1567_v50 = vadd.f32 1.0, %v2640_v49  ;;  %v2642_v51 = vpop.eup %2641 }
 0x73e   :  { %v1574_v52 = vadd.f32 1.0, %v2642_v51 }
 0x73f   :  { %2643 = vrcp.f32 %v1567_v50 }
 0x740   :  { %2645 = vrcp.f32 %v1574_v52 }
 0x749   :  { %v2644_v54 = vpop.eup %2643 }
 0x74a   :  { %v1577_v55 = vmul.f32 %v2644_v54, %v1558_v53  ;;  %v2646_v58 = vpop.eup %2645  ;;  %v2676_v53 = vld [vmem:[#allocation8 + $0x20] sm:$0xff]   ;;  %v2677_v54 = vld [vmem:[#allocation8 + $0x28] sm:$0xff]  }
 0x74b   :  { %v1580_v59 = vsub.f32 1.0, %v2646_v58  ;;  %v1582_v61 = vmul.f32 %v2646_v58, %v1419_v15 }
 0x74c   :  { %v1578_v57 = vadd.f32 %v1577_v55, %v1438_v56 }
 0x74e   :  { %2647 = vtanh.f32 %v1578_v57 }
 0x758   :  { %v2648_v60 = vpop.eup %2647 }
 0x759   :  { %v1581_v62 = vmul.f32 %v2648_v60, %v1580_v59  ;;  %v1762_v60 = vld [vmem:[#allocation2 + $0x38] sm:$0xff] }
 0x75b   :  { %v3130_v0 = vadd.f32 %v1582_v61, %v1581_v62 }
 0x75d   :  { %v1603_v1 = vpack.c.bf16 %v3130_v0, %v3130_v0  ;;  %v1584_v2 = vmul.f32 %v2978_v11, %v3130_v0 }
 0x75f   :  { %2504 = vmatmul.mubr.msk.bf16.vlgmr.msra.gmra.mrb[52].mxu1 %vm239_vm1, %v1603_v1  ;;  %2512 = vmatmul.mubr.msk.bf16.vlgmr.msra.gmra.mrb[52].mxu0 %vm239_vm1, %v1603_v1  ;;  %v1585_v3 = vsel %vm239_vm1, %v1584_v2, 0.0 }
 0x760   :  { %2516 = vmatpush3.bf16.msra.mxu1 %v2906_v42  ;;  %1586 = vadd.xlane.f32.xlu1 %v1585_v3  ;;  %v2675_v42 = vld [vmem:[#allocation8 + $0x10] sm:$0xff]  }
 0x761   :  { %2517 = vmatprep.subr.bf16.mxu1 %v2730_v14  ;;  %2519 = vmatprep.mubr.msk.bf16.mxu1 %vm2732_vm2, %v2730_v14 }
 0x762   :  { %2524 = vmatpush3.bf16.msra.mxu0 %v2886_v40  ;;  %2527 = vmatprep.mubr.msk.bf16.mxu0 %vm2732_vm2, %v2730_v14  ;;  %v3156_v40 = vpop.xlane.xlu1 %1422 }
 0x763   :  { %2525 = vmatprep.subr.bf16.mxu0 %v2730_v14 }
 0x764   :  { %2518 = vmatpush3.bf16.msra.mxu1 %v2910_v43 }
 0x765   :  { %2531 = vmatprep.subr.bf16.mxu1 %v2730_v14 }
 0x766   :  { %2526 = vmatpush3.bf16.msra.mxu0 %v2892_v41 }
 0x767   :  { %2520 = vmatmul.mubr.msk.bf16.vlgmr.msra.gmra.mrb[56].mxu1 %vm239_vm1, %v1603_v1  ;;  %2539 = vmatprep.subr.bf16.mxu0 %v2730_v14 }
 0x768   :  { %2532 = vmatpush3.bf16.msra.mxu1 %v2675_v42  ;;  %2535 = vmatprep.mubr.msk.bf16.mxu1 %vm2732_vm2, %v2730_v14 }
 0x769   :  { %2533 = vmatprep.subr.bf16.mxu1 %v2730_v14 }
 0x76c   :  { %2534 = vmatpush3.bf16.msra.mxu1 %v2873_v32 }
 0x7ed   :  { %v1587_v43 = vpop.xlane.xlu1 %1586 }
 0x7ee   :  { %v1588_v4 = vadd.f32 %v3008_v17, %v1587_v43 }
 0x7f0   :  { %1592 = vperm.xlu0 %2567, %v1588_v4  }
 0x832   :  { %v1641_v41 = vpop.f32.mrb[52].mxu1  ;;  %v1681_v5 = vpop.f32.mrb[52].mxu0 }
 0x833   :  { %v1642_v6 = vadd.f32 %v2960_v38, %v1641_v41  ;;  %v2505_v7 = vpop.f32.mrb[53].mxu1  ;;  %v2513_v8 = vpop.f32.mrb[53].mxu0  ;;  %v1682_v10 = vadd.f32 %v2965_v39, %v1681_v5 }
 0x834   :  { %v1644_v12 = vpop.f32.mrb[54].mxu1  ;;  %v1684_v13 = vpop.f32.mrb[54].mxu0 }
 0x835   :  { %v1727_v15 = vadd.f32 %v1642_v6, %v1598_v9  ;;  %v2506_v16 = vpop.f32.mrb[55].mxu1  ;;  %v2514_v32 = vpop.f32.mrb[55].mxu0  ;;  %v1734_v20 = vadd.f32 %v1682_v10, %v1600_v19 }
 0x837   :  { %v2198_v18 = vmul.f32 -1.442695, %v1727_v15  ;;  %v2199_v23 = vmul.f32 -1.442695, %v1734_v20  ;;  %v1766_v15 = vld [vmem:[#allocation4 + $0x38] sm:$0xff] }
 0x839   :  { %2649 = vpow2.f32 %v2198_v18 }
 0x83a   :  { %v1721_v21 = vpop.f32.mrb[56].mxu1  ;;  %2651 = vpow2.f32 %v2199_v23 }
 0x83b   :  { %v2521_v22 = vpop.f32.mrb[57].mxu1  ;;  %v1722_v30 = vadd.f32 %v2972_v63, %v1721_v21 }
 0x83c   :  { %v1724_v24 = vpop.f32.mrb[58].mxu1 }
 0x83d   :  { %v2522_v25 = vpop.f32.mrb[59].mxu1 }
 0x83e   :  { %v1096_v25 = vadd.f32 %v3008_v17, %v3097_v33  ;;  %v549_v33 = vlaneseq }
 0x843   :  { %v2650_v26 = vpop.eup %2649 }
 0x844   :  { %v1731_v28 = vadd.f32 1.0, %v2650_v26  ;;  %v2652_v27 = vpop.eup %2651  ;;  %v1424_v26 = vadd.f32 %v3008_v17, %v3156_v40  ;;  %v773_v40 = vpop.permute.xlu0 %772 }
 0x845   :  { %v1738_v29 = vadd.f32 1.0, %v2652_v27 }
 0x846   :  { %2653 = vrcp.f32 %v1731_v28 }
 0x847   :  { %2655 = vrcp.f32 %v1738_v29 }
 0x850   :  { %v2654_v34 = vpop.eup %2653 }
 0x851   :  { %v1741_v35 = vmul.f32 %v2654_v34, %v1722_v30  ;;  %v2656_v44 = vpop.eup %2655  ;;  %v3190_v34 = vand.u32 127, %v549_v33 }
 0x852   :  { %v1744_v45 = vsub.f32 1.0, %v2656_v44  ;;  %v1746_v47 = vmul.f32 %v2656_v44, %v3130_v0 }
 0x853   :  { %v1742_v37 = vadd.f32 %v1741_v35, %v1602_v36  ;;  %vm933_vm3 = vcmp.eq.s32.totalorder %v3190_v34, 1  ;;  %vm769_vm4 = vcmp.eq.s32.totalorder %v3190_v34, 0  ;;  %vm1097_vm5 = vcmp.eq.s32.totalorder %v3190_v34, 2 }
 0x854   :  { %vm1261_vm6 = vcmp.eq.s32.totalorder %v3190_v34, 3  ;;  %vm1425_vm7 = vcmp.eq.s32.totalorder %v3190_v34, 4  ;;  %vm1589_vm8 = vcmp.eq.s32.totalorder %v3190_v34, 5  ;;  %vm1753_vm9 = vcmp.eq.s32.totalorder %v3190_v34, 6 }
 0x855   :  { %2657 = vtanh.f32 %v1742_v37  ;;  %v775_v37 = vsel %vm769_vm4, %v773_v40, 0.0  ;;  %vm1917_vm10 = vcmp.eq.s32.totalorder %v3190_v34, 7  ;;  %vm1984_vm4 = vcmask 23552  }
 0x85f   :  { %v2658_v46 = vpop.eup %2657 }
 0x860   :  { %v1745_v48 = vmul.f32 %v2658_v46, %v1744_v45 }
 0x862   :  { %v1747_v49 = vadd.f32 %v1746_v47, %v1745_v48 }
 0x864   :  { %v1767_v50 = vpack.c.bf16 %v1747_v49, %v1747_v49  ;;  %v1748_v51 = vmul.f32 %v2978_v11, %v1747_v49 }
 0x866   :  { %2528 = vmatmul.mubr.msk.bf16.vlgmr.msra.gmra.mrb[56].mxu0 %vm239_vm1, %v1767_v50  ;;  %2536 = vmatmul.mubr.msk.bf16.vlgmr.msra.gmra.mrb[60].mxu1 %vm239_vm1, %v1767_v50  ;;  %v1749_v52 = vsel %vm239_vm1, %v1748_v51, 0.0 }
 0x867   :  { %2540 = vmatpush3.bf16.msra.mxu0 %v2676_v53  ;;  %1750 = vadd.xlane.f32.xlu1 %v1749_v52 }
 0x868   :  { %2541 = vmatprep.subr.bf16.mxu0 %v2730_v14  ;;  %2543 = vmatprep.mubr.msk.bf16.mxu0 %vm2732_vm2, %v2730_v14  ;;  %v1764_v14 = vld [vmem:[#allocation3 + $0x38] sm:$0xff]  ;;  %vm1940_vm2 = vcmask 7168  }
 0x86b   :  { %2542 = vmatpush3.bf16.msra.mxu0 %v2677_v54 }
 0x86e   :  { %2544 = vmatmul.mubr.msk.bf16.vlgmr.msra.gmra.mrb[60].mxu0 %vm239_vm1, %v1767_v50 }
 0x8f4   :  { %v1751_v28 = vpop.xlane.xlu1 %1750 }
 0x8f5   :  { %v1752_v27 = vadd.f32 %v3008_v17, %v1751_v28 }
 0x939   :  { %v1805_v55 = vpop.f32.mrb[56].mxu0  ;;  %v1845_v56 = vpop.f32.mrb[60].mxu1 }
 0x93a   :  { %v1806_v57 = vadd.f32 %v2960_v38, %v1805_v55  ;;  %v2529_v58 = vpop.f32.mrb[57].mxu0  ;;  %v2537_v59 = vpop.f32.mrb[61].mxu1  ;;  %v1846_v61 = vadd.f32 %v2965_v39, %v1845_v56 }
 0x93b   :  { %v1808_v62 = vpop.f32.mrb[58].mxu0  ;;  %v1848_v0 = vpop.f32.mrb[62].mxu1 }
 0x93c   :  { %v1891_v1 = vadd.f32 %v1806_v57, %v1762_v60  ;;  %v2530_v2 = vpop.f32.mrb[59].mxu0  ;;  %v2538_v3 = vpop.f32.mrb[63].mxu1  ;;  %v1898_v43 = vadd.f32 %v1846_v61, %v1764_v14 }
 0x93e   :  { %v2203_v42 = vmul.f32 -1.442695, %v1891_v1  ;;  %v2204_v5 = vmul.f32 -1.442695, %v1898_v43 }
 0x940   :  { %2659 = vpow2.f32 %v2203_v42 }
 0x941   :  { %v1885_v4 = vpop.f32.mrb[60].mxu0  ;;  %2661 = vpow2.f32 %v2204_v5 }
 0x942   :  { %v2545_v41 = vpop.f32.mrb[61].mxu0  ;;  %v1886_v10 = vadd.f32 %v2972_v63, %v1885_v4  ;;  %v932_v63 = vadd.f32 %v3008_v17, %v3095_v31 }
 0x943   :  { %v1888_v6 = vpop.f32.mrb[62].mxu0 }
 0x944   :  { %v2546_v7 = vpop.f32.mrb[63].mxu0  ;;  %v1943_v6 = vadd.s32 1, %v3190_v34 }
 0x94a   :  { %v2660_v38 = vpop.eup %2659 }
 0x94b   :  { %v1895_v8 = vadd.f32 1.0, %v2660_v38  ;;  %v2662_v9 = vpop.eup %2661 }
 0x94c   :  { %v1902_v39 = vadd.f32 1.0, %v2662_v9 }
 0x94d   :  { %2663 = vrcp.f32 %v1895_v8 }
 0x94e   :  { %2665 = vrcp.f32 %v1902_v39  ;;  %v1966_v39 = vadd.s32 2, %v3190_v34 }
 0x957   :  { %v2664_v12 = vpop.eup %2663 }
 0x958   :  { %v1905_v13 = vmul.f32 %v2664_v12, %v1886_v10  ;;  %v2666_v32 = vpop.eup %2665 }
 0x959   :  { %v1908_v18 = vsub.f32 1.0, %v2666_v32  ;;  %v1910_v21 = vmul.f32 %v2666_v32, %v1747_v49  ;;  %v1987_v32 = vadd.s32 3, %v3190_v34 }
 0x95a   :  { %v1906_v16 = vadd.f32 %v1905_v13, %v1766_v15 }
 0x95c   :  { %2667 = vtanh.f32 %v1906_v16 }
 0x966   :  { %v2668_v19 = vpop.eup %2667 }
 0x967   :  { %v1909_v20 = vmul.f32 %v2668_v19, %v1908_v18 }
 0x969   :  { %v1911_v22 = vadd.f32 %v1910_v21, %v1909_v20 }
 0x96b   :  { %v1912_v23 = vmul.f32 %v2978_v11, %v1911_v22  ;;  %v3186_v11 = vld [vmem:[%s3310_s0] sm:$0xff]  ;;  %s2733_s0 = smov 2  }
 0x96d   :  { %v1913_v24 = vsel %vm239_vm1, %v1912_v23, 0.0 }
 0x96e   :  { %1914 = vadd.xlane.f32.xlu1 %v1913_v24  ;;  %v2008_v24 = vadd.s32 4, %v3190_v34 }
 0x97f   :  { %936 = vperm.xlu1 %2568, %v932_v63  }
 0x983   :  { %1100 = vperm.xlu1 %2568, %v1096_v25   ;;  %v2027_v25 = vadd.s32 5, %v3190_v34 }
 0x987   :  { %1428 = vperm.xlu1 %2568, %v1424_v26  }
 0x98b   :  { %1756 = vperm.xlu1 %2568, %v1752_v27  }
 0x98f   :  { %1927 = vperm.xlu1 %2568, %v3186_v11  }
 0x9fb   :  { %v1915_v31 = vpop.xlane.xlu1 %1914 }
 0x9fc   :  { %v1916_v29 = vadd.f32 %v3008_v17, %v1915_v31  ;;  %v1265_v17 = vpop.permute.xlu0 %1264 }
 0x9fd   :  { %v1267_v48 = vsel %vm1261_vm6, %v1265_v17, 0.0  ;;  %vm1963_vm6 = vcmask 15360  }
 0x9fe   :  { %1920 = vperm.xlu0 %2567, %v1916_v29  }
 0x9ff   :  { %v937_v30 = vpop.permute.xlu1 %936 }
 0xa00   :  { %v939_v36 = vsel %vm933_vm3, %v937_v30, 0.0  ;;  %v1593_v51 = vpop.permute.xlu0 %1592  ;;  %vm2005_vm3 = vcmask 31744  }
 0xa01   :  { %v940_v45 = vadd.f32 %v939_v36, %v775_v37  ;;  %v1595_v54 = vsel %vm1589_vm8, %v1593_v51, 0.0  ;;  %v2046_v51 = vadd.s32 6, %v3190_v34 }
 0xa03   :  { %v1101_v35 = vpop.permute.xlu1 %1100 }
 0xa04   :  { %v1103_v44 = vsel %vm1097_vm5, %v1101_v35, 0.0 }
 0xa05   :  { %v1104_v46 = vadd.f32 %v1103_v44, %v940_v45 }
 0xa07   :  { %v1429_v47 = vpop.permute.xlu1 %1428  ;;  %v1268_v49 = vadd.f32 %v1267_v48, %v1104_v46 }
 0xa08   :  { %v1431_v50 = vsel %vm1425_vm7, %v1429_v47, 0.0 }
 0xa09   :  { %v1432_v52 = vadd.f32 %v1431_v50, %v1268_v49 }
 0xa0b   :  { %v1757_v53 = vpop.permute.xlu1 %1756  ;;  %v1596_v55 = vadd.f32 %v1595_v54, %v1432_v52 }
 0xa0c   :  { %v1759_v56 = vsel %vm1753_vm9, %v1757_v53, 0.0 }
 0xa0d   :  { %v1760_v57 = vadd.f32 %v1759_v56, %v1596_v55  ;;  %v2065_v55 = vadd.s32 7, %v3190_v34 }
 0xa0f   :  { %v3212_v2 = vpop.permute.xlu1 %1927 }
 0xa10   :  { %vm1944_vm12 = vcmp.lt.s32.totalorder %v1943_v6, %v3212_v2  ;;  %vm1929_vm13 = vcmp.lt.s32.totalorder %v3190_v34, %v3212_v2  ;;  %vm1967_vm0 = vcmp.lt.s32.totalorder %v1966_v39, %v3212_v2  ;;  %vm1988_vm1 = vcmp.lt.s32.totalorder %v1987_v32, %v3212_v2 }
 0xa11   :  { %vm2009_vm5 = vcmp.lt.s32.totalorder %v2008_v24, %v3212_v2  ;;  %vm2028_vm7 = vcmp.lt.s32.totalorder %v2027_v25, %v3212_v2  ;;  %vm2047_vm8 = vcmp.lt.s32.totalorder %v2046_v51, %v3212_v2  ;;  %vm2066_vm9 = vcmp.lt.s32.totalorder %v2065_v55, %v3212_v2 }
 0xa7d   :  { %v1921_v58 = vpop.permute.xlu0 %1920 }
 0xa7e   :  { %v1923_v59 = vsel %vm1917_vm10, %v1921_v58, 0.0 }
 0xa7f   :  { %v3200_v60 = vadd.f32 %v1923_v59, %v1760_v57 }
 0xa81   :  { %v1930_v61 = vsub.f32 0.0, %v3200_v60  ;;  %1960 = vrot.lane.b32.xlu1 %v3200_v60, %s2733_s0  ;;  %1937 = vrot.lane.b32.xlu0 %v3200_v60, %s2734_s28 }
 0xa83   :  { %v1931_v62 = vmul.f32 1.442695, %v1930_v61 }
 0xa85   :  { %2669 = vpow2.f32 %v1931_v62  ;;  %2002 = vrot.lane.b32.xlu1 %v3200_v60, %s2728_s25  ;;  %1981 = vrot.lane.b32.xlu0 %v3200_v60, %s2735_s29  ;;  %s2742_s25 = smov 125  }
 0xa89   :  { %2041 = vrot.lane.b32.xlu1 %v3200_v60, %s2736_s2  ;;  %2022 = vrot.lane.b32.xlu0 %v3200_v60, %s2737_s30 }
 0xa8d   :  { %2060 = vrot.lane.b32.xlu0 %v3200_v60, %s2738_s11 }
 0xa8f   :  { %v2670_v0 = vpop.eup %2669 }
 0xa90   :  { %1975 = vrot.lane.b32.xlu1 %v2670_v0, %s2739_s12  ;;  %v1933_v1 = vmul.f32 %v2670_v0, %v3200_v60  ;;  %v1935_v12 = vsel %vm1929_vm13, %v2670_v0, 0.0 }
 0xa91   :  { %1954 = vrot.lane.b32.xlu0 %v2670_v0, %s2740_s13 }
 0xa92   :  { %v1934_v35 = vsel %vm1929_vm13, %v1933_v1, 0.0 }
 0xa94   :  { %2016 = vrot.lane.b32.xlu1 %v2670_v0, %s2741_s14 }
 0xa95   :  { %1996 = vrot.lane.b32.xlu0 %v2670_v0, %s2742_s25 }
 0xa98   :  { %2054 = vrot.lane.b32.xlu1 %v2670_v0, %s2743_s15 }
 0xa99   :  { %2035 = vrot.lane.b32.xlu0 %v2670_v0, %s2744_s17 }
 0xa9c   :  { %1946 = vrot.lane.b32.xlu1 %v1933_v1, %s2740_s13 }
 0xa9d   :  { %1968 = vrot.lane.b32.xlu0 %v1933_v1, %s2739_s12 }
 0xaa0   :  { %1989 = vrot.lane.b32.xlu1 %v1933_v1, %s2742_s25 }
 0xaa1   :  { %2010 = vrot.lane.b32.xlu0 %v1933_v1, %s2741_s14 }
 0xaa4   :  { %2029 = vrot.lane.b32.xlu1 %v1933_v1, %s2744_s17 }
 0xaa5   :  { %2048 = vrot.lane.b32.xlu0 %v1933_v1, %s2743_s15 }
 0xaa8   :  { %2067 = vrot.lane.b32.xlu1 %v1933_v1, %s2745_s18 }
 0xaa9   :  { %2073 = vrot.lane.b32.xlu0 %v2670_v0, %s2745_s18 }
 0xaf3   :  { %v1961_v3 = vpop.permute.xlu1 %1960  ;;  %v1938_v42 = vpop.permute.xlu0 %1937 }
 0xaf4   :  { %v1941_v27 = vsel %vm1940_vm2, inf, %v1938_v42  ;;  %v1964_v50 = vsel %vm1963_vm6, inf, %v1961_v3 }
 0xaf5   :  { %v1942_v37 = vmin.f32 %v3200_v60, %v1941_v27 }
 0xaf7   :  { %v3214_v14 = vpop.permute.xlu0 %1981  ;;  %v3216_v43 = vpop.permute.xlu1 %2002  ;;  %v1965_v52 = vmin.f32 %v1942_v37, %v1964_v50 }
 0xaf8   :  { %v1985_v56 = vsel %vm1984_vm4, inf, %v3214_v14 }
 0xaf9   :  { %v1986_v62 = vmin.f32 %v1965_v52, %v1985_v56 }
 0xafb   :  { %v3218_v4 = vpop.permute.xlu0 %2022  ;;  %v3220_v41 = vpop.permute.xlu1 %2041 }
 0xaff   :  { %v3222_v5 = vpop.permute.xlu0 %2060 }
 0xb02   :  { %v1976_v7 = vpop.permute.xlu1 %1975 }
 0xb03   :  { %v1955_v38 = vpop.permute.xlu0 %1954  ;;  %v1978_v15 = vsel %vm1971_vm14, %v1976_v7, 0.0 }
 0xb04   :  { %v1957_v8 = vsel %vm1949_vm11, %v1955_v38, 0.0  ;;  %v1979_v20 = vsel %vm1967_vm0, %v1978_v15, 0.0 }
 0xb05   :  { %v1958_v9 = vsel %vm1944_vm12, %v1957_v8, 0.0  ;;  %v2006_v8 = vsel %vm2005_vm3, inf, %v3216_v43 }
 0xb06   :  { %v2017_v10 = vpop.permute.xlu1 %2016  ;;  %v1959_v16 = vadd.f32 %v1958_v9, %v1935_v12  ;;  %v2007_v39 = vmin.f32 %v1986_v62, %v2006_v8  ;;  %v2025_v12 = vsel %vm1992_vm15, inf, %v3218_v4 }
 0xb07   :  { %v1997_v13 = vpop.permute.xlu0 %1996  ;;  %v2019_v31 = vsel %vm2005_vm3, %v2017_v10, 0.0 }
 0xb08   :  { %v1999_v18 = vsel %vm1992_vm15, %v1997_v13, 0.0  ;;  %v1980_v22 = vadd.f32 %v1979_v20, %v1959_v16  ;;  %v2020_v44 = vsel %vm2009_vm5, %v2019_v31, 0.0 }
 0xb09   :  { %v2000_v23 = vsel %vm1988_vm1, %v1999_v18, 0.0  ;;  %v2026_v18 = vmin.f32 %v2007_v39, %v2025_v12 }
 0xb0a   :  { %v2055_v19 = vpop.permute.xlu1 %2054  ;;  %v2001_v29 = vadd.f32 %v2000_v23, %v1980_v22  ;;  %v2063_v23 = vsel %vm1949_vm11, inf, %v3222_v5 }
 0xb0b   :  { %v2036_v21 = vpop.permute.xlu0 %2035  ;;  %v2057_v57 = vsel %vm1963_vm6, %v2055_v19, 0.0 }
 0xb0c   :  { %v2038_v40 = vsel %vm1984_vm4, %v2036_v21, 0.0  ;;  %v2021_v46 = vadd.f32 %v2020_v44, %v2001_v29  ;;  %v2058_v0 = vsel %vm2047_vm8, %v2057_v57, 0.0  ;;  %v2044_v21 = vsel %vm1971_vm14, inf, %v3220_v41 }
 0xb0d   :  { %v2039_v48 = vsel %vm2028_vm7, %v2038_v40, 0.0  ;;  %v2045_v4 = vmin.f32 %v2026_v18, %v2044_v21 }
 0xb0e   :  { %v1947_v63 = vpop.permute.xlu1 %1946  ;;  %v2040_v58 = vadd.f32 %v2039_v48, %v2021_v46 }
 0xb0f   :  { %v1950_v26 = vsel %vm1949_vm11, %v1947_v63, 0.0  ;;  %v1969_v28 = vpop.permute.xlu0 %1968  ;;  %v2064_v63 = vmin.f32 %v2045_v4, %v2063_v23 }
 0xb10   :  { %v1951_v33 = vsel %vm1944_vm12, %v1950_v26, 0.0  ;;  %v1972_v30 = vsel %vm1971_vm14, %v1969_v28, 0.0  ;;  %v2059_v14 = vadd.f32 %v2058_v0, %v2040_v58  ;;  %vm2098_vm12 = vcmask 64512  }
 0xb11   :  { %v1952_v45 = vadd.f32 %v1951_v33, %v1934_v35  ;;  %v1973_v47 = vsel %vm1967_vm0, %v1972_v30, 0.0  ;;  %v2092_v27 = vmul.f32 0.5, %v2064_v63  ;;  %vm2094_vm14 = vcmp.gt.s32.totalorder %v3186_v11, 1 }
 0xb12   :  { %v1990_v36 = vpop.permute.xlu1 %1989  ;;  %v2095_v5 = vsel %vm2094_vm14, %v3186_v11, 1 }
 0xb13   :  { %v2011_v17 = vpop.permute.xlu0 %2010  ;;  %v1993_v49 = vsel %vm1992_vm15, %v1990_v36, 0.0  ;;  %v1974_v53 = vadd.f32 %v1973_v47, %v1952_v45  ;;  %v2096_v30 = vcvt.s32.f32 %v2095_v5 }
 0xb14   :  { %v1994_v59 = vsel %vm1988_vm1, %v1993_v49, 0.0  ;;  %v2013_v60 = vsel %vm2005_vm3, %v2011_v17, 0.0 }
 0xb15   :  { %v1995_v1 = vadd.f32 %v1994_v59, %v1974_v53  ;;  %v2014_v42 = vsel %vm2009_vm5, %v2013_v60, 0.0 }
 0xb16   :  { %v2030_v61 = vpop.permute.xlu1 %2029 }
 0xb17   :  { %v2049_v54 = vpop.permute.xlu0 %2048  ;;  %v2032_v7 = vsel %vm1984_vm4, %v2030_v61, 0.0  ;;  %v2015_v10 = vadd.f32 %v2014_v42, %v1995_v1 }
 0xb18   :  { %v2033_v13 = vsel %vm2028_vm7, %v2032_v7, 0.0  ;;  %v2051_v15 = vsel %vm1963_vm6, %v2049_v54, 0.0 }
 0xb19   :  { %v2034_v19 = vadd.f32 %v2033_v13, %v2015_v10  ;;  %v2052_v43 = vsel %vm2047_vm8, %v2051_v15, 0.0 }
 0xb1a   :  { %v2068_v32 = vpop.permute.xlu1 %2067 }
 0xb1b   :  { %v2074_v3 = vpop.permute.xlu0 %2073  ;;  %v2070_v20 = vsel %vm1940_vm2, %v2068_v32, 0.0  ;;  %v2053_v22 = vadd.f32 %v2052_v43, %v2034_v19 }
 0xb1c   :  { %v2076_v6 = vsel %vm1940_vm2, %v2074_v3, 0.0  ;;  %v2071_v24 = vsel %vm2066_vm9, %v2070_v20, 0.0 }
 0xb1d   :  { %v2077_v38 = vsel %vm2066_vm9, %v2076_v6, 0.0  ;;  %v2072_v25 = vadd.f32 %v2071_v24, %v2053_v22 }
 0xb1e   :  { %v2078_v9 = vadd.f32 %v2077_v38, %v2059_v14 }
 0xb20   :  { %vm2087_vm10 = vcmp.gt.f32.partialorder %v2078_v9, 0.0 }
 0xb21   :  { %v2088_v16 = vsel %vm2087_vm10, %v2078_v9, 1.0 }
 0xb22   :  { %2671 = vrcp.f32 %v2088_v16 }
 0xb23   :  { %2673 = vrcp.f32 %v2096_v30 }
 0xb2c   :  { %v2672_v26 = vpop.eup %2671 }
 0xb2d   :  { %v2090_v28 = vmul.f32 %v2672_v26, %v2072_v25  ;;  %v2674_v40 = vpop.eup %2673 }
 0xb2f   :  { %v2091_v31 = vmul.f32 0.5, %v2090_v28 }
 0xb31   :  { %v2093_v29 = vadd.f32 %v2092_v27, %v2091_v31 }
 0xb33   :  { %v2097_v41 = vsel %vm1929_vm13, %v2093_v29, 0.0 }
 0xb34   :  { %v2099_v33 = vsel %vm2098_vm12, %v2097_v41, 0.0 }
 0xb35   :  { %2100 = vadd.xlane.f32.xlu1 %v2099_v33 }
 0xbc2   :  { %v2101_v35 = vpop.xlane.xlu1 %2100 }
 0xbc3   :  { %v2103_v36 = vmul.f32 %v2674_v40, %v2101_v35 }
 0xbc5   :  { %2104 = vst.msk [vmem:[%s3320_s10] sm:$0xff] %vm1940_vm2, %v2103_v36 }
 0xbc6   :  { %2109 = vsyncpa [#allocation7], 1 }
 0xbc7   :  { %2110 = vsyncpa [#allocation9], 1 }

</bundles_post_ra>
